<compile_context>
chip_gen: v7x
topology: tpu7x:2x2x1
jax: 0.10.0
libtpu: 0.0.40
codegen_flags: <defaults>
</compile_context>

<pallas_src>
import jax
import jax.numpy as jnp
from jax.experimental import pallas as pl
from jax.experimental.pallas import tpu as pltpu


# ----------------------------- Pallas kernel -----------------------------

def _downsample_block_kernel(wA_ref, wB_ref, re_ref, ro_ref, re_halo_ref, out_ref):
    """TH output rows of conv1x1(conv3x3_stride2(x)) for one batch element.

    wA_ref      : (3, Cout, 2C)  fused weights for taps (ky, kx=0|1), ky = 0..2
    wB_ref      : (3, Cout, C)   fused weights for taps (ky, kx=2)
    re_ref      : (1, TH, 2C, Wo+1)  even padded rows 2*(h*TH+r); channels = [even cols ; odd cols]
    ro_ref      : (1, TH, 2C, Wo+1)  odd  padded rows 2*(h*TH+r)+1
    re_halo_ref : (1, 1,  2C, Wo+1)  even padded row 2*(h*TH+TH) (ky=2 halo for the last row)
    out_ref     : (1, TH, Cout, Wo)
    """
    TH = out_ref.shape[1]
    Wo = out_ref.shape[3]
    C = re_ref.shape[2] // 2

    for r in range(TH):                       # static unroll over the row block
        e_cur = re_ref[0, r]                  # (2C, Wo+1) padded row 2*ho
        o_cur = ro_ref[0, r]                  # (2C, Wo+1) padded row 2*ho+1
        if r + 1 < TH:
            e_nxt = re_ref[0, r + 1]          # padded row 2*ho+2
        else:
            e_nxt = re_halo_ref[0, 0]

        # kx = 0,1 taps: first C channels = even cols (kx=0), next C = odd cols (kx=1)
        y = jnp.dot(wA_ref[0], e_cur[:, :Wo], preferred_element_type=jnp.float32)
        y += jnp.dot(wA_ref[1], o_cur[:, :Wo], preferred_element_type=jnp.float32)
        y += jnp.dot(wA_ref[2], e_nxt[:, :Wo], preferred_element_type=jnp.float32)
        # kx = 2 taps: even-col channels shifted one output column
        y += jnp.dot(wB_ref[0], e_cur[:C, 1:Wo + 1], preferred_element_type=jnp.float32)
        y += jnp.dot(wB_ref[1], o_cur[:C, 1:Wo + 1], preferred_element_type=jnp.float32)
        y += jnp.dot(wB_ref[2], e_nxt[:C, 1:Wo + 1], preferred_element_type=jnp.float32)

        out_ref[0, r] = y.astype(out_ref.dtype)   # dense (Cout, Wo) store


# ------------------------------ JAX wrapper -------------------------------

def _pick_th(Ho, Wo, C, Cout, in_itemsize, out_itemsize, vmem_budget_bytes):
    """Largest row-block (divisor of Ho, capped at 32) fitting the VMEM budget;
    stops early once TH*Wo reaches ~512 lanes of output per step."""
    best = 1
    for d in range(1, Ho + 1):
        if Ho % d or d > 32:
            continue
        in_bytes = 2 * (2 * d + 1) * (2 * C) * (Wo + 1) * in_itemsize   # double-buffered phases
        out_bytes = 2 * d * Cout * Wo * out_itemsize
        w_bytes = 9 * C * Cout * in_itemsize
        if in_bytes + out_bytes + w_bytes > vmem_budget_bytes:
            continue
        best = d
        if d * Wo >= 512:
            break
    return best


def downsample_forward(x_nchw, w_down, w_1x1, *, compute_dtype=jnp.bfloat16,
                       vmem_limit_bytes=48 * 1024 * 1024):
    """x_nchw: (B, Cin, H, W); w_down: (Cin, Cin, 3, 3); w_1x1: (Cout, Cin, 1, 1).

    Returns (B, Cout, Ho, Wo) with Ho = ceil(H/2), Wo = ceil(W/2).
    compute_dtype=bfloat16 (default) halves HBM/VMEM traffic; accumulation is f32.
    """
    B, C, H, W = x_nchw.shape
    Cout = w_1x1.shape[0]
    Ho = (H + 2 - 3) // 2 + 1
    Wo = (W + 2 - 3) // 2 + 1

    out_dtype = x_nchw.dtype
    dt = out_dtype if compute_dtype is None else jnp.dtype(compute_dtype)

    # ---- glue: cast FIRST, then build the two channel-stacked row-parity phases ----
    x_c = x_nchw.astype(dt)

    def row_phase(a):
        """(B, n_rows, 2C, Wo+1): [even padded cols ; odd padded cols] at padded rows 2k+a."""
        n_rows = Ho + 1 if a == 0 else Ho
        parts = []
        for b_par in (0, 1):                   # 0: even padded cols, 1: odd padded cols
            xr = x_c[:, :, (1 - a)::2, (1 - b_par)::2]
            parts.append(jnp.pad(
                xr, ((0, 0), (0, 0),
                     (1 - a, n_rows - (1 - a) - xr.shape[2]),
                     (1 - b_par, (Wo + 1) - (1 - b_par) - xr.shape[3]))))
        ph = jnp.concatenate(parts, axis=1)    # (B, 2C, n_rows, Wo+1)
        return jnp.transpose(ph, (0, 2, 1, 3))  # (B, n_rows, 2C, Wo+1)

    row_e = row_phase(0)   # padded rows 0,2,...,2Ho   -> (B, Ho+1, 2C, Wo+1)
    row_o = row_phase(1)   # padded rows 1,3,...,2Ho-1 -> (B, Ho,   2C, Wo+1)

    # ---- pre-fuse the 1x1 conv into the nine 3x3 taps (in f32, then cast) ----
    w3 = jnp.transpose(w_down, (2, 3, 0, 1)).reshape(9, C, C).astype(jnp.float32)  # (t, c_mid, c_in)
    w1 = w_1x1.reshape(Cout, C).astype(jnp.float32)
    wf = jnp.einsum('oc,tci->oti', w1, w3)                           # (Cout, 9, C), t = 3*ky+kx
    wA = jnp.stack([jnp.concatenate([wf[:, 3 * g], wf[:, 3 * g + 1]], axis=-1)
                    for g in range(3)]).astype(dt)                   # (3, Cout, 2C)  kx = 0|1
    wB = jnp.stack([wf[:, 3 * g + 2] for g in range(3)]).astype(dt)  # (3, Cout, C)   kx = 2

    isz = jnp.dtype(dt).itemsize
    osz = jnp.dtype(out_dtype).itemsize
    TH = _pick_th(Ho, Wo, C, Cout, isz, osz, int(vmem_limit_bytes * 0.6))

    cost = pl.CostEstimate(
        flops=2 * B * Ho * Wo * Cout * 9 * C,
        transcendentals=0,
        bytes_accessed=int(B * (2 * Ho + Ho // TH) * 2 * C * (Wo + 1) * isz
                           + 9 * Cout * C * isz
                           + B * Ho * Cout * Wo * osz),
    )

    main_spec = pl.BlockSpec((1, TH, 2 * C, Wo + 1), lambda b, h: (b, h, 0, 0))
    halo_spec = pl.BlockSpec((1, 1, 2 * C, Wo + 1),
                             lambda b, h: (b, (h + 1) * TH, 0, 0))

    y = pl.pallas_call(
        _downsample_block_kernel,
        out_shape=jax.ShapeDtypeStruct((B, Ho, Cout, Wo), out_dtype),
        grid_spec=pltpu.PrefetchScalarGridSpec(
            num_scalar_prefetch=0,
            grid=(B, Ho // TH),
            in_specs=[
                pl.BlockSpec((3, Cout, 2 * C), lambda b, h: (0, 0, 0)),  # wA (resident)
                pl.BlockSpec((3, Cout, C), lambda b, h: (0, 0, 0)),      # wB (resident)
                main_spec,    # row_e rows [h*TH, h*TH+TH)
                main_spec,    # row_o rows [h*TH, h*TH+TH)
                halo_spec,    # row_e row  h*TH+TH (ky=2 halo, 1 row only)
            ],
            out_specs=pl.BlockSpec((1, TH, Cout, Wo), lambda b, h: (b, h, 0, 0)),
        ),
        compiler_params=pltpu.CompilerParams(
            dimension_semantics=("parallel", "parallel"),
            vmem_limit_bytes=vmem_limit_bytes),
        cost_estimate=cost,
    )(wA, wB, row_e, row_o, row_e)

    # (B, Ho, Cout, Wo) -> NCHW; output is 1/4 the input's spatial size so this is cheap.
    return jnp.transpose(y, (0, 2, 1, 3))


# ------------------------------- reference --------------------------------

def downsample_reference(x_nchw, w_down, w_1x1):
    dn = jax.lax.conv_general_dilated(
        x_nchw, w_down, window_strides=(2, 2), padding=((1, 1), (1, 1)),
        dimension_numbers=("NCHW", "OIHW", "NCHW"))
    return jax.lax.conv_general_dilated(
        dn, w_1x1, window_strides=(1, 1), padding=((0, 0), (0, 0)),
        dimension_numbers=("NCHW", "OIHW", "NCHW"))


# --------------------------------- main ------------------------------------

if __name__ == "__main__":
    B, Cin, Cout, H, W = 2, 4, 8, 16, 16

    key = jax.random.PRNGKey(0)
    k_x, k_d, k_1 = jax.random.split(key, 3)

    x = jax.random.normal(k_x, (B, Cin, H, W), dtype=jnp.float32)
    # Deterministic synthetic parameters matching nn.Conv2d weight shapes.
    w_down = jax.random.uniform(k_d, (Cin, Cin, 3, 3), jnp.float32,
                                minval=-1.0, maxval=1.0) / jnp.sqrt(Cin * 9.0)
    w_1x1 = jax.random.uniform(k_1, (Cout, Cin, 1, 1), jnp.float32,
                               minval=-1.0, maxval=1.0) / jnp.sqrt(float(Cin))

    ref = downsample_reference(x, w_down, w_1x1)

    # f32 compute path: tight check against the XLA conv reference.
    out_f32 = jax.block_until_ready(
        downsample_forward(x, w_down, w_1x1, compute_dtype=jnp.float32))
    assert out_f32.shape == (B, Cout, H // 2, W // 2), out_f32.shape
    assert jnp.allclose(out_f32, ref, atol=1e-4, rtol=1e-4), float(
        jnp.max(jnp.abs(out_f32 - ref)))

    # Default bf16 compute path (f32 accumulation): loose check.
    out_bf16 = jax.block_until_ready(downsample_forward(x, w_down, w_1x1))
    assert out_bf16.shape == (B, Cout, H // 2, W // 2), out_bf16.shape
    assert jnp.allclose(out_bf16.astype(jnp.float32), ref, atol=1e-1, rtol=1e-1), float(
        jnp.max(jnp.abs(out_bf16.astype(jnp.float32) - ref)))

    print("KERNEL_OK")
</pallas_src>

<mosaic_0001>
module attributes {stable_mosaic.version = 11 : i64} {
  func.func @_downsample_block_kernel(%arg0: i32, %arg1: i32, %arg2: memref<3x8x8xf32, #tpu.memory_space<vmem>>, %arg3: memref<3x8x4xf32, #tpu.memory_space<vmem>>, %arg4: memref<1x8x8x9xf32, #tpu.memory_space<vmem>>, %arg5: memref<1x8x8x9xf32, #tpu.memory_space<vmem>>, %arg6: memref<1x1x8x9xf32, #tpu.memory_space<vmem>>, %arg7: memref<1x8x8x8xf32, #tpu.memory_space<vmem>>) attributes {dimension_semantics = [#tpu.dimension_semantics<parallel>, #tpu.dimension_semantics<parallel>], iteration_bounds = array<i64: 2, 1>, scalar_prefetch = 0 : i64, scratch_operands = 0 : i64, tpu.core_type = #tpu.core_type<tc>, window_params = [{pipeline_mode = #tpu.pipeline_mode<synchronous>, transform_indices = @transform_0, window_bounds = array<i64: 3, 8, 8>}, {pipeline_mode = #tpu.pipeline_mode<synchronous>, transform_indices = @transform_1, window_bounds = array<i64: 3, 8, 4>}, {transform_indices = @transform_2, window_bounds = array<i64: 1, 8, 8, 9>}, {transform_indices = @transform_3, window_bounds = array<i64: 1, 8, 8, 9>}, {transform_indices = @transform_4, window_bounds = array<i64: 1, 1, 8, 9>}, {transform_indices = @transform_5, window_bounds = array<i64: 1, 8, 8, 8>}]} {
    %c0 = arith.constant 0 : index
    %c0_0 = arith.constant 0 : index
    %c0_1 = arith.constant 0 : index
    %c0_2 = arith.constant 0 : index
    %0 = vector.load %arg4[%c0, %c0_0, %c0_1, %c0_2] : memref<1x8x8x9xf32, #tpu.memory_space<vmem>>, vector<1x1x8x9xf32>
    %1 = vector.shape_cast %0 : vector<1x1x8x9xf32> to vector<8x9xf32>
    %c0_3 = arith.constant 0 : index
    %c0_4 = arith.constant 0 : index
    %c0_5 = arith.constant 0 : index
    %c0_6 = arith.constant 0 : index
    %2 = vector.load %arg5[%c0_3, %c0_4, %c0_5, %c0_6] : memref<1x8x8x9xf32, #tpu.memory_space<vmem>>, vector<1x1x8x9xf32>
    %3 = vector.shape_cast %2 : vector<1x1x8x9xf32> to vector<8x9xf32>
    %c0_7 = arith.constant 0 : index
    %c1 = arith.constant 1 : index
    %c0_8 = arith.constant 0 : index
    %c0_9 = arith.constant 0 : index
    %4 = vector.load %arg4[%c0_7, %c1, %c0_8, %c0_9] : memref<1x8x8x9xf32, #tpu.memory_space<vmem>>, vector<1x1x8x9xf32>
    %5 = vector.shape_cast %4 : vector<1x1x8x9xf32> to vector<8x9xf32>
    %c0_10 = arith.constant 0 : index
    %c0_11 = arith.constant 0 : index
    %c0_12 = arith.constant 0 : index
    %6 = vector.load %arg2[%c0_10, %c0_11, %c0_12] : memref<3x8x8xf32, #tpu.memory_space<vmem>>, vector<1x8x8xf32>
    %7 = vector.shape_cast %6 : vector<1x8x8xf32> to vector<8x8xf32>
    %8 = vector.extract_strided_slice %1 {offsets = [0, 0], sizes = [8, 8], strides = [1, 1]} : vector<8x9xf32> to vector<8x8xf32>
    %cst = arith.constant dense<0.000000e+00> : vector<8x8xf32>
    %9 = tpu.matmul %7, %8, %cst {dimension_numbers = #tpu.dot_dimension_numbers<[1], [0], [0], [1], [0, 0, 1, 1], [], []>} : vector<8x8xf32>, vector<8x8xf32>, vector<8x8xf32> -> vector<8x8xf32>
    %c1_13 = arith.constant 1 : index
    %c0_14 = arith.constant 0 : index
    %c0_15 = arith.constant 0 : index
    %10 = vector.load %arg2[%c1_13, %c0_14, %c0_15] : memref<3x8x8xf32, #tpu.memory_space<vmem>>, vector<1x8x8xf32>
    %11 = vector.shape_cast %10 : vector<1x8x8xf32> to vector<8x8xf32>
    %12 = vector.extract_strided_slice %3 {offsets = [0, 0], sizes = [8, 8], strides = [1, 1]} : vector<8x9xf32> to vector<8x8xf32>
    %cst_16 = arith.constant dense<0.000000e+00> : vector<8x8xf32>
    %13 = tpu.matmul %11, %12, %cst_16 {dimension_numbers = #tpu.dot_dimension_numbers<[1], [0], [0], [1], [0, 0, 1, 1], [], []>} : vector<8x8xf32>, vector<8x8xf32>, vector<8x8xf32> -> vector<8x8xf32>
    %14 = arith.addf %9, %13 : vector<8x8xf32>
    %c2 = arith.constant 2 : index
    %c0_17 = arith.constant 0 : index
    %c0_18 = arith.constant 0 : index
    %15 = vector.load %arg2[%c2, %c0_17, %c0_18] : memref<3x8x8xf32, #tpu.memory_space<vmem>>, vector<1x8x8xf32>
    %16 = vector.shape_cast %15 : vector<1x8x8xf32> to vector<8x8xf32>
    %17 = vector.extract_strided_slice %5 {offsets = [0, 0], sizes = [8, 8], strides = [1, 1]} : vector<8x9xf32> to vector<8x8xf32>
    %cst_19 = arith.constant dense<0.000000e+00> : vector<8x8xf32>
    %18 = tpu.matmul %16, %17, %cst_19 {dimension_numbers = #tpu.dot_dimension_numbers<[1], [0], [0], [1], [0, 0, 1, 1], [], []>} : vector<8x8xf32>, vector<8x8xf32>, vector<8x8xf32> -> vector<8x8xf32>
    %19 = arith.addf %14, %18 : vector<8x8xf32>
    %c0_20 = arith.constant 0 : index
    %c0_21 = arith.constant 0 : index
    %c0_22 = arith.constant 0 : index
    %20 = vector.load %arg3[%c0_20, %c0_21, %c0_22] : memref<3x8x4xf32, #tpu.memory_space<vmem>>, vector<1x8x4xf32>
    %21 = vector.shape_cast %20 : vector<1x8x4xf32> to vector<8x4xf32>
    %22 = vector.extract_strided_slice %1 {offsets = [0, 1], sizes = [4, 8], strides = [1, 1]} : vector<8x9xf32> to vector<4x8xf32>
    %cst_23 = arith.constant dense<0.000000e+00> : vector<8x8xf32>
    %23 = tpu.matmul %21, %22, %cst_23 {dimension_numbers = #tpu.dot_dimension_numbers<[1], [0], [0], [1], [0, 0, 1, 1], [], []>} : vector<8x4xf32>, vector<4x8xf32>, vector<8x8xf32> -> vector<8x8xf32>
    %24 = arith.addf %19, %23 : vector<8x8xf32>
    %c1_24 = arith.constant 1 : index
    %c0_25 = arith.constant 0 : index
    %c0_26 = arith.constant 0 : index
    %25 = vector.load %arg3[%c1_24, %c0_25, %c0_26] : memref<3x8x4xf32, #tpu.memory_space<vmem>>, vector<1x8x4xf32>
    %26 = vector.shape_cast %25 : vector<1x8x4xf32> to vector<8x4xf32>
    %27 = vector.extract_strided_slice %3 {offsets = [0, 1], sizes = [4, 8], strides = [1, 1]} : vector<8x9xf32> to vector<4x8xf32>
    %cst_27 = arith.constant dense<0.000000e+00> : vector<8x8xf32>
    %28 = tpu.matmul %26, %27, %cst_27 {dimension_numbers = #tpu.dot_dimension_numbers<[1], [0], [0], [1], [0, 0, 1, 1], [], []>} : vector<8x4xf32>, vector<4x8xf32>, vector<8x8xf32> -> vector<8x8xf32>
    %29 = arith.addf %24, %28 : vector<8x8xf32>
    %c2_28 = arith.constant 2 : index
    %c0_29 = arith.constant 0 : index
    %c0_30 = arith.constant 0 : index
    %30 = vector.load %arg3[%c2_28, %c0_29, %c0_30] : memref<3x8x4xf32, #tpu.memory_space<vmem>>, vector<1x8x4xf32>
    %31 = vector.shape_cast %30 : vector<1x8x4xf32> to vector<8x4xf32>
    %32 = vector.extract_strided_slice %5 {offsets = [0, 1], sizes = [4, 8], strides = [1, 1]} : vector<8x9xf32> to vector<4x8xf32>
    %cst_31 = arith.constant dense<0.000000e+00> : vector<8x8xf32>
    %33 = tpu.matmul %31, %32, %cst_31 {dimension_numbers = #tpu.dot_dimension_numbers<[1], [0], [0], [1], [0, 0, 1, 1], [], []>} : vector<8x4xf32>, vector<4x8xf32>, vector<8x8xf32> -> vector<8x8xf32>
    %34 = arith.addf %29, %33 : vector<8x8xf32>
    %c0_32 = arith.constant 0 : index
    %c0_33 = arith.constant 0 : index
    %c0_34 = arith.constant 0 : index
    %c0_35 = arith.constant 0 : index
    %35 = vector.load %arg7[%c0_32, %c0_33, %c0_34, %c0_35] : memref<1x8x8x8xf32, #tpu.memory_space<vmem>>, vector<1x1x8x8xf32>
    %36 = vector.shape_cast %35 : vector<1x1x8x8xf32> to vector<8x8xf32>
    %37 = vector.shape_cast %34 : vector<8x8xf32> to vector<1x1x8x8xf32>
    tpu.vector_store %arg7[%c0_32, %c0_33, %c0_34, %c0_35], %37 {strides = array<i32>} : memref<1x8x8x8xf32, #tpu.memory_space<vmem>>, vector<1x1x8x8xf32>,
    %c0_36 = arith.constant 0 : index
    %c1_37 = arith.constant 1 : index
    %c0_38 = arith.constant 0 : index
    %c0_39 = arith.constant 0 : index
    %38 = vector.load %arg4[%c0_36, %c1_37, %c0_38, %c0_39] : memref<1x8x8x9xf32, #tpu.memory_space<vmem>>, vector<1x1x8x9xf32>
    %39 = vector.shape_cast %38 : vector<1x1x8x9xf32> to vector<8x9xf32>
    %c0_40 = arith.constant 0 : index
    %c1_41 = arith.constant 1 : index
    %c0_42 = arith.constant 0 : index
    %c0_43 = arith.constant 0 : index
    %40 = vector.load %arg5[%c0_40, %c1_41, %c0_42, %c0_43] : memref<1x8x8x9xf32, #tpu.memory_space<vmem>>, vector<1x1x8x9xf32>
    %41 = vector.shape_cast %40 : vector<1x1x8x9xf32> to vector<8x9xf32>
    %c0_44 = arith.constant 0 : index
    %c2_45 = arith.constant 2 : index
    %c0_46 = arith.constant 0 : index
    %c0_47 = arith.constant 0 : index
    %42 = vector.load %arg4[%c0_44, %c2_45, %c0_46, %c0_47] : memref<1x8x8x9xf32, #tpu.memory_space<vmem>>, vector<1x1x8x9xf32>
    %43 = vector.shape_cast %42 : vector<1x1x8x9xf32> to vector<8x9xf32>
    %c0_48 = arith.constant 0 : index
    %c0_49 = arith.constant 0 : index
    %c0_50 = arith.constant 0 : index
    %44 = vector.load %arg2[%c0_48, %c0_49, %c0_50] : memref<3x8x8xf32, #tpu.memory_space<vmem>>, vector<1x8x8xf32>
    %45 = vector.shape_cast %44 : vector<1x8x8xf32> to vector<8x8xf32>
    %46 = vector.extract_strided_slice %39 {offsets = [0, 0], sizes = [8, 8], strides = [1, 1]} : vector<8x9xf32> to vector<8x8xf32>
    %cst_51 = arith.constant dense<0.000000e+00> : vector<8x8xf32>
    %47 = tpu.matmul %45, %46, %cst_51 {dimension_numbers = #tpu.dot_dimension_numbers<[1], [0], [0], [1], [0, 0, 1, 1], [], []>} : vector<8x8xf32>, vector<8x8xf32>, vector<8x8xf32> -> vector<8x8xf32>
    %c1_52 = arith.constant 1 : index
    %c0_53 = arith.constant 0 : index
    %c0_54 = arith.constant 0 : index
    %48 = vector.load %arg2[%c1_52, %c0_53, %c0_54] : memref<3x8x8xf32, #tpu.memory_space<vmem>>, vector<1x8x8xf32>
    %49 = vector.shape_cast %48 : vector<1x8x8xf32> to vector<8x8xf32>
    %50 = vector.extract_strided_slice %41 {offsets = [0, 0], sizes = [8, 8], strides = [1, 1]} : vector<8x9xf32> to vector<8x8xf32>
    %cst_55 = arith.constant dense<0.000000e+00> : vector<8x8xf32>
    %51 = tpu.matmul %49, %50, %cst_55 {dimension_numbers = #tpu.dot_dimension_numbers<[1], [0], [0], [1], [0, 0, 1, 1], [], []>} : vector<8x8xf32>, vector<8x8xf32>, vector<8x8xf32> -> vector<8x8xf32>
    %52 = arith.addf %47, %51 : vector<8x8xf32>
    %c2_56 = arith.constant 2 : index
    %c0_57 = arith.constant 0 : index
    %c0_58 = arith.constant 0 : index
    %53 = vector.load %arg2[%c2_56, %c0_57, %c0_58] : memref<3x8x8xf32, #tpu.memory_space<vmem>>, vector<1x8x8xf32>
    %54 = vector.shape_cast %53 : vector<1x8x8xf32> to vector<8x8xf32>
    %55 = vector.extract_strided_slice %43 {offsets = [0, 0], sizes = [8, 8], strides = [1, 1]} : vector<8x9xf32> to vector<8x8xf32>
    %cst_59 = arith.constant dense<0.000000e+00> : vector<8x8xf32>
    %56 = tpu.matmul %54, %55, %cst_59 {dimension_numbers = #tpu.dot_dimension_numbers<[1], [0], [0], [1], [0, 0, 1, 1], [], []>} : vector<8x8xf32>, vector<8x8xf32>, vector<8x8xf32> -> vector<8x8xf32>
    %57 = arith.addf %52, %56 : vector<8x8xf32>
    %c0_60 = arith.constant 0 : index
    %c0_61 = arith.constant 0 : index
    %c0_62 = arith.constant 0 : index
    %58 = vector.load %arg3[%c0_60, %c0_61, %c0_62] : memref<3x8x4xf32, #tpu.memory_space<vmem>>, vector<1x8x4xf32>
    %59 = vector.shape_cast %58 : vector<1x8x4xf32> to vector<8x4xf32>
    %60 = vector.extract_strided_slice %39 {offsets = [0, 1], sizes = [4, 8], strides = [1, 1]} : vector<8x9xf32> to vector<4x8xf32>
    %cst_63 = arith.constant dense<0.000000e+00> : vector<8x8xf32>
    %61 = tpu.matmul %59, %60, %cst_63 {dimension_numbers = #tpu.dot_dimension_numbers<[1], [0], [0], [1], [0, 0, 1, 1], [], []>} : vector<8x4xf32>, vector<4x8xf32>, vector<8x8xf32> -> vector<8x8xf32>
    %62 = arith.addf %57, %61 : vector<8x8xf32>
    %c1_64 = arith.constant 1 : index
    %c0_65 = arith.constant 0 : index
    %c0_66 = arith.constant 0 : index
    %63 = vector.load %arg3[%c1_64, %c0_65, %c0_66] : memref<3x8x4xf32, #tpu.memory_space<vmem>>, vector<1x8x4xf32>
    %64 = vector.shape_cast %63 : vector<1x8x4xf32> to vector<8x4xf32>
    %65 = vector.extract_strided_slice %41 {offsets = [0, 1], sizes = [4, 8], strides = [1, 1]} : vector<8x9xf32> to vector<4x8xf32>
    %cst_67 = arith.constant dense<0.000000e+00> : vector<8x8xf32>
    %66 = tpu.matmul %64, %65, %cst_67 {dimension_numbers = #tpu.dot_dimension_numbers<[1], [0], [0], [1], [0, 0, 1, 1], [], []>} : vector<8x4xf32>, vector<4x8xf32>, vector<8x8xf32> -> vector<8x8xf32>
    %67 = arith.addf %62, %66 : vector<8x8xf32>
    %c2_68 = arith.constant 2 : index
    %c0_69 = arith.constant 0 : index
    %c0_70 = arith.constant 0 : index
    %68 = vector.load %arg3[%c2_68, %c0_69, %c0_70] : memref<3x8x4xf32, #tpu.memory_space<vmem>>, vector<1x8x4xf32>
    %69 = vector.shape_cast %68 : vector<1x8x4xf32> to vector<8x4xf32>
    %70 = vector.extract_strided_slice %43 {offsets = [0, 1], sizes = [4, 8], strides = [1, 1]} : vector<8x9xf32> to vector<4x8xf32>
    %cst_71 = arith.constant dense<0.000000e+00> : vector<8x8xf32>
    %71 = tpu.matmul %69, %70, %cst_71 {dimension_numbers = #tpu.dot_dimension_numbers<[1], [0], [0], [1], [0, 0, 1, 1], [], []>} : vector<8x4xf32>, vector<4x8xf32>, vector<8x8xf32> -> vector<8x8xf32>
    %72 = arith.addf %67, %71 : vector<8x8xf32>
    %c0_72 = arith.constant 0 : index
    %c1_73 = arith.constant 1 : index
    %c0_74 = arith.constant 0 : index
    %c0_75 = arith.constant 0 : index
    %73 = vector.load %arg7[%c0_72, %c1_73, %c0_74, %c0_75] : memref<1x8x8x8xf32, #tpu.memory_space<vmem>>, vector<1x1x8x8xf32>
    %74 = vector.shape_cast %73 : vector<1x1x8x8xf32> to vector<8x8xf32>
    %75 = vector.shape_cast %72 : vector<8x8xf32> to vector<1x1x8x8xf32>
    tpu.vector_store %arg7[%c0_72, %c1_73, %c0_74, %c0_75], %75 {strides = array<i32>} : memref<1x8x8x8xf32, #tpu.memory_space<vmem>>, vector<1x1x8x8xf32>,
    %c0_76 = arith.constant 0 : index
    %c2_77 = arith.constant 2 : index
    %c0_78 = arith.constant 0 : index
    %c0_79 = arith.constant 0 : index
    %76 = vector.load %arg4[%c0_76, %c2_77, %c0_78, %c0_79] : memref<1x8x8x9xf32, #tpu.memory_space<vmem>>, vector<1x1x8x9xf32>
    %77 = vector.shape_cast %76 : vector<1x1x8x9xf32> to vector<8x9xf32>
    %c0_80 = arith.constant 0 : index
    %c2_81 = arith.constant 2 : index
    %c0_82 = arith.constant 0 : index
    %c0_83 = arith.constant 0 : index
    %78 = vector.load %arg5[%c0_80, %c2_81, %c0_82, %c0_83] : memref<1x8x8x9xf32, #tpu.memory_space<vmem>>, vector<1x1x8x9xf32>
    %79 = vector.shape_cast %78 : vector<1x1x8x9xf32> to vector<8x9xf32>
    %c0_84 = arith.constant 0 : index
    %c3 = arith.constant 3 : index
    %c0_85 = arith.constant 0 : index
    %c0_86 = arith.constant 0 : index
    %80 = vector.load %arg4[%c0_84, %c3, %c0_85, %c0_86] : memref<1x8x8x9xf32, #tpu.memory_space<vmem>>, vector<1x1x8x9xf32>
    %81 = vector.shape_cast %80 : vector<1x1x8x9xf32> to vector<8x9xf32>
    %c0_87 = arith.constant 0 : index
    %c0_88 = arith.constant 0 : index
    %c0_89 = arith.constant 0 : index
    %82 = vector.load %arg2[%c0_87, %c0_88, %c0_89] : memref<3x8x8xf32, #tpu.memory_space<vmem>>, vector<1x8x8xf32>
    %83 = vector.shape_cast %82 : vector<1x8x8xf32> to vector<8x8xf32>
    %84 = vector.extract_strided_slice %77 {offsets = [0, 0], sizes = [8, 8], strides = [1, 1]} : vector<8x9xf32> to vector<8x8xf32>
    %cst_90 = arith.constant dense<0.000000e+00> : vector<8x8xf32>
    %85 = tpu.matmul %83, %84, %cst_90 {dimension_numbers = #tpu.dot_dimension_numbers<[1], [0], [0], [1], [0, 0, 1, 1], [], []>} : vector<8x8xf32>, vector<8x8xf32>, vector<8x8xf32> -> vector<8x8xf32>
    %c1_91 = arith.constant 1 : index
    %c0_92 = arith.constant 0 : index
    %c0_93 = arith.constant 0 : index
    %86 = vector.load %arg2[%c1_91, %c0_92, %c0_93] : memref<3x8x8xf32, #tpu.memory_space<vmem>>, vector<1x8x8xf32>
    %87 = vector.shape_cast %86 : vector<1x8x8xf32> to vector<8x8xf32>
    %88 = vector.extract_strided_slice %79 {offsets = [0, 0], sizes = [8, 8], strides = [1, 1]} : vector<8x9xf32> to vector<8x8xf32>
    %cst_94 = arith.constant dense<0.000000e+00> : vector<8x8xf32>
    %89 = tpu.matmul %87, %88, %cst_94 {dimension_numbers = #tpu.dot_dimension_numbers<[1], [0], [0], [1], [0, 0, 1, 1], [], []>} : vector<8x8xf32>, vector<8x8xf32>, vector<8x8xf32> -> vector<8x8xf32>
    %90 = arith.addf %85, %89 : vector<8x8xf32>
    %c2_95 = arith.constant 2 : index
    %c0_96 = arith.constant 0 : index
    %c0_97 = arith.constant 0 : index
    %91 = vector.load %arg2[%c2_95, %c0_96, %c0_97] : memref<3x8x8xf32, #tpu.memory_space<vmem>>, vector<1x8x8xf32>
    %92 = vector.shape_cast %91 : vector<1x8x8xf32> to vector<8x8xf32>
    %93 = vector.extract_strided_slice %81 {offsets = [0, 0], sizes = [8, 8], strides = [1, 1]} : vector<8x9xf32> to vector<8x8xf32>
    %cst_98 = arith.constant dense<0.000000e+00> : vector<8x8xf32>
    %94 = tpu.matmul %92, %93, %cst_98 {dimension_numbers = #tpu.dot_dimension_numbers<[1], [0], [0], [1], [0, 0, 1, 1], [], []>} : vector<8x8xf32>, vector<8x8xf32>, vector<8x8xf32> -> vector<8x8xf32>
    %95 = arith.addf %90, %94 : vector<8x8xf32>
    %c0_99 = arith.constant 0 : index
    %c0_100 = arith.constant 0 : index
    %c0_101 = arith.constant 0 : index
    %96 = vector.load %arg3[%c0_99, %c0_100, %c0_101] : memref<3x8x4xf32, #tpu.memory_space<vmem>>, vector<1x8x4xf32>
    %97 = vector.shape_cast %96 : vector<1x8x4xf32> to vector<8x4xf32>
    %98 = vector.extract_strided_slice %77 {offsets = [0, 1], sizes = [4, 8], strides = [1, 1]} : vector<8x9xf32> to vector<4x8xf32>
    %cst_102 = arith.constant dense<0.000000e+00> : vector<8x8xf32>
    %99 = tpu.matmul %97, %98, %cst_102 {dimension_numbers = #tpu.dot_dimension_numbers<[1], [0], [0], [1], [0, 0, 1, 1], [], []>} : vector<8x4xf32>, vector<4x8xf32>, vector<8x8xf32> -> vector<8x8xf32>
    %100 = arith.addf %95, %99 : vector<8x8xf32>
    %c1_103 = arith.constant 1 : index
    %c0_104 = arith.constant 0 : index
    %c0_105 = arith.constant 0 : index
    %101 = vector.load %arg3[%c1_103, %c0_104, %c0_105] : memref<3x8x4xf32, #tpu.memory_space<vmem>>, vector<1x8x4xf32>
    %102 = vector.shape_cast %101 : vector<1x8x4xf32> to vector<8x4xf32>
    %103 = vector.extract_strided_slice %79 {offsets = [0, 1], sizes = [4, 8], strides = [1, 1]} : vector<8x9xf32> to vector<4x8xf32>
    %cst_106 = arith.constant dense<0.000000e+00> : vector<8x8xf32>
    %104 = tpu.matmul %102, %103, %cst_106 {dimension_numbers = #tpu.dot_dimension_numbers<[1], [0], [0], [1], [0, 0, 1, 1], [], []>} : vector<8x4xf32>, vector<4x8xf32>, vector<8x8xf32> -> vector<8x8xf32>
    %105 = arith.addf %100, %104 : vector<8x8xf32>
    %c2_107 = arith.constant 2 : index
    %c0_108 = arith.constant 0 : index
    %c0_109 = arith.constant 0 : index
    %106 = vector.load %arg3[%c2_107, %c0_108, %c0_109] : memref<3x8x4xf32, #tpu.memory_space<vmem>>, vector<1x8x4xf32>
    %107 = vector.shape_cast %106 : vector<1x8x4xf32> to vector<8x4xf32>
    %108 = vector.extract_strided_slice %81 {offsets = [0, 1], sizes = [4, 8], strides = [1, 1]} : vector<8x9xf32> to vector<4x8xf32>
    %cst_110 = arith.constant dense<0.000000e+00> : vector<8x8xf32>
    %109 = tpu.matmul %107, %108, %cst_110 {dimension_numbers = #tpu.dot_dimension_numbers<[1], [0], [0], [1], [0, 0, 1, 1], [], []>} : vector<8x4xf32>, vector<4x8xf32>, vector<8x8xf32> -> vector<8x8xf32>
    %110 = arith.addf %105, %109 : vector<8x8xf32>
    %c0_111 = arith.constant 0 : index
    %c2_112 = arith.constant 2 : index
    %c0_113 = arith.constant 0 : index
    %c0_114 = arith.constant 0 : index
    %111 = vector.load %arg7[%c0_111, %c2_112, %c0_113, %c0_114] : memref<1x8x8x8xf32, #tpu.memory_space<vmem>>, vector<1x1x8x8xf32>
    %112 = vector.shape_cast %111 : vector<1x1x8x8xf32> to vector<8x8xf32>
    %113 = vector.shape_cast %110 : vector<8x8xf32> to vector<1x1x8x8xf32>
    tpu.vector_store %arg7[%c0_111, %c2_112, %c0_113, %c0_114], %113 {strides = array<i32>} : memref<1x8x8x8xf32, #tpu.memory_space<vmem>>, vector<1x1x8x8xf32>,
    %c0_115 = arith.constant 0 : index
    %c3_116 = arith.constant 3 : index
    %c0_117 = arith.constant 0 : index
    %c0_118 = arith.constant 0 : index
    %114 = vector.load %arg4[%c0_115, %c3_116, %c0_117, %c0_118] : memref<1x8x8x9xf32, #tpu.memory_space<vmem>>, vector<1x1x8x9xf32>
    %115 = vector.shape_cast %114 : vector<1x1x8x9xf32> to vector<8x9xf32>
    %c0_119 = arith.constant 0 : index
    %c3_120 = arith.constant 3 : index
    %c0_121 = arith.constant 0 : index
    %c0_122 = arith.constant 0 : index
    %116 = vector.load %arg5[%c0_119, %c3_120, %c0_121, %c0_122] : memref<1x8x8x9xf32, #tpu.memory_space<vmem>>, vector<1x1x8x9xf32>
    %117 = vector.shape_cast %116 : vector<1x1x8x9xf32> to vector<8x9xf32>
    %c0_123 = arith.constant 0 : index
    %c4 = arith.constant 4 : index
    %c0_124 = arith.constant 0 : index
    %c0_125 = arith.constant 0 : index
    %118 = vector.load %arg4[%c0_123, %c4, %c0_124, %c0_125] : memref<1x8x8x9xf32, #tpu.memory_space<vmem>>, vector<1x1x8x9xf32>
    %119 = vector.shape_cast %118 : vector<1x1x8x9xf32> to vector<8x9xf32>
    %c0_126 = arith.constant 0 : index
    %c0_127 = arith.constant 0 : index
    %c0_128 = arith.constant 0 : index
    %120 = vector.load %arg2[%c0_126, %c0_127, %c0_128] : memref<3x8x8xf32, #tpu.memory_space<vmem>>, vector<1x8x8xf32>
    %121 = vector.shape_cast %120 : vector<1x8x8xf32> to vector<8x8xf32>
    %122 = vector.extract_strided_slice %115 {offsets = [0, 0], sizes = [8, 8], strides = [1, 1]} : vector<8x9xf32> to vector<8x8xf32>
    %cst_129 = arith.constant dense<0.000000e+00> : vector<8x8xf32>
    %123 = tpu.matmul %121, %122, %cst_129 {dimension_numbers = #tpu.dot_dimension_numbers<[1], [0], [0], [1], [0, 0, 1, 1], [], []>} : vector<8x8xf32>, vector<8x8xf32>, vector<8x8xf32> -> vector<8x8xf32>
    %c1_130 = arith.constant 1 : index
    %c0_131 = arith.constant 0 : index
    %c0_132 = arith.constant 0 : index
    %124 = vector.load %arg2[%c1_130, %c0_131, %c0_132] : memref<3x8x8xf32, #tpu.memory_space<vmem>>, vector<1x8x8xf32>
    %125 = vector.shape_cast %124 : vector<1x8x8xf32> to vector<8x8xf32>
    %126 = vector.extract_strided_slice %117 {offsets = [0, 0], sizes = [8, 8], strides = [1, 1]} : vector<8x9xf32> to vector<8x8xf32>
    %cst_133 = arith.constant dense<0.000000e+00> : vector<8x8xf32>
    %127 = tpu.matmul %125, %126, %cst_133 {dimension_numbers = #tpu.dot_dimension_numbers<[1], [0], [0], [1], [0, 0, 1, 1], [], []>} : vector<8x8xf32>, vector<8x8xf32>, vector<8x8xf32> -> vector<8x8xf32>
    %128 = arith.addf %123, %127 : vector<8x8xf32>
    %c2_134 = arith.constant 2 : index
    %c0_135 = arith.constant 0 : index
    %c0_136 = arith.constant 0 : index
    %129 = vector.load %arg2[%c2_134, %c0_135, %c0_136] : memref<3x8x8xf32, #tpu.memory_space<vmem>>, vector<1x8x8xf32>
    %130 = vector.shape_cast %129 : vector<1x8x8xf32> to vector<8x8xf32>
    %131 = vector.extract_strided_slice %119 {offsets = [0, 0], sizes = [8, 8], strides = [1, 1]} : vector<8x9xf32> to vector<8x8xf32>
    %cst_137 = arith.constant dense<0.000000e+00> : vector<8x8xf32>
    %132 = tpu.matmul %130, %131, %cst_137 {dimension_numbers = #tpu.dot_dimension_numbers<[1], [0], [0], [1], [0, 0, 1, 1], [], []>} : vector<8x8xf32>, vector<8x8xf32>, vector<8x8xf32> -> vector<8x8xf32>
    %133 = arith.addf %128, %132 : vector<8x8xf32>
    %c0_138 = arith.constant 0 : index
    %c0_139 = arith.constant 0 : index
    %c0_140 = arith.constant 0 : index
    %134 = vector.load %arg3[%c0_138, %c0_139, %c0_140] : memref<3x8x4xf32, #tpu.memory_space<vmem>>, vector<1x8x4xf32>
    %135 = vector.shape_cast %134 : vector<1x8x4xf32> to vector<8x4xf32>
    %136 = vector.extract_strided_slice %115 {offsets = [0, 1], sizes = [4, 8], strides = [1, 1]} : vector<8x9xf32> to vector<4x8xf32>
    %cst_141 = arith.constant dense<0.000000e+00> : vector<8x8xf32>
    %137 = tpu.matmul %135, %136, %cst_141 {dimension_numbers = #tpu.dot_dimension_numbers<[1], [0], [0], [1], [0, 0, 1, 1], [], []>} : vector<8x4xf32>, vector<4x8xf32>, vector<8x8xf32> -> vector<8x8xf32>
    %138 = arith.addf %133, %137 : vector<8x8xf32>
    %c1_142 = arith.constant 1 : index
    %c0_143 = arith.constant 0 : index
    %c0_144 = arith.constant 0 : index
    %139 = vector.load %arg3[%c1_142, %c0_143, %c0_144] : memref<3x8x4xf32, #tpu.memory_space<vmem>>, vector<1x8x4xf32>
    %140 = vector.shape_cast %139 : vector<1x8x4xf32> to vector<8x4xf32>
    %141 = vector.extract_strided_slice %117 {offsets = [0, 1], sizes = [4, 8], strides = [1, 1]} : vector<8x9xf32> to vector<4x8xf32>
    %cst_145 = arith.constant dense<0.000000e+00> : vector<8x8xf32>
    %142 = tpu.matmul %140, %141, %cst_145 {dimension_numbers = #tpu.dot_dimension_numbers<[1], [0], [0], [1], [0, 0, 1, 1], [], []>} : vector<8x4xf32>, vector<4x8xf32>, vector<8x8xf32> -> vector<8x8xf32>
    %143 = arith.addf %138, %142 : vector<8x8xf32>
    %c2_146 = arith.constant 2 : index
    %c0_147 = arith.constant 0 : index
    %c0_148 = arith.constant 0 : index
    %144 = vector.load %arg3[%c2_146, %c0_147, %c0_148] : memref<3x8x4xf32, #tpu.memory_space<vmem>>, vector<1x8x4xf32>
    %145 = vector.shape_cast %144 : vector<1x8x4xf32> to vector<8x4xf32>
    %146 = vector.extract_strided_slice %119 {offsets = [0, 1], sizes = [4, 8], strides = [1, 1]} : vector<8x9xf32> to vector<4x8xf32>
    %cst_149 = arith.constant dense<0.000000e+00> : vector<8x8xf32>
    %147 = tpu.matmul %145, %146, %cst_149 {dimension_numbers = #tpu.dot_dimension_numbers<[1], [0], [0], [1], [0, 0, 1, 1], [], []>} : vector<8x4xf32>, vector<4x8xf32>, vector<8x8xf32> -> vector<8x8xf32>
    %148 = arith.addf %143, %147 : vector<8x8xf32>
    %c0_150 = arith.constant 0 : index
    %c3_151 = arith.constant 3 : index
    %c0_152 = arith.constant 0 : index
    %c0_153 = arith.constant 0 : index
    %149 = vector.load %arg7[%c0_150, %c3_151, %c0_152, %c0_153] : memref<1x8x8x8xf32, #tpu.memory_space<vmem>>, vector<1x1x8x8xf32>
    %150 = vector.shape_cast %149 : vector<1x1x8x8xf32> to vector<8x8xf32>
    %151 = vector.shape_cast %148 : vector<8x8xf32> to vector<1x1x8x8xf32>
    tpu.vector_store %arg7[%c0_150, %c3_151, %c0_152, %c0_153], %151 {strides = array<i32>} : memref<1x8x8x8xf32, #tpu.memory_space<vmem>>, vector<1x1x8x8xf32>,
    %c0_154 = arith.constant 0 : index
    %c4_155 = arith.constant 4 : index
    %c0_156 = arith.constant 0 : index
    %c0_157 = arith.constant 0 : index
    %152 = vector.load %arg4[%c0_154, %c4_155, %c0_156, %c0_157] : memref<1x8x8x9xf32, #tpu.memory_space<vmem>>, vector<1x1x8x9xf32>
    %153 = vector.shape_cast %152 : vector<1x1x8x9xf32> to vector<8x9xf32>
    %c0_158 = arith.constant 0 : index
    %c4_159 = arith.constant 4 : index
    %c0_160 = arith.constant 0 : index
    %c0_161 = arith.constant 0 : index
    %154 = vector.load %arg5[%c0_158, %c4_159, %c0_160, %c0_161] : memref<1x8x8x9xf32, #tpu.memory_space<vmem>>, vector<1x1x8x9xf32>
    %155 = vector.shape_cast %154 : vector<1x1x8x9xf32> to vector<8x9xf32>
    %c0_162 = arith.constant 0 : index
    %c5 = arith.constant 5 : index
    %c0_163 = arith.constant 0 : index
    %c0_164 = arith.constant 0 : index
    %156 = vector.load %arg4[%c0_162, %c5, %c0_163, %c0_164] : memref<1x8x8x9xf32, #tpu.memory_space<vmem>>, vector<1x1x8x9xf32>
    %157 = vector.shape_cast %156 : vector<1x1x8x9xf32> to vector<8x9xf32>
    %c0_165 = arith.constant 0 : index
    %c0_166 = arith.constant 0 : index
    %c0_167 = arith.constant 0 : index
    %158 = vector.load %arg2[%c0_165, %c0_166, %c0_167] : memref<3x8x8xf32, #tpu.memory_space<vmem>>, vector<1x8x8xf32>
    %159 = vector.shape_cast %158 : vector<1x8x8xf32> to vector<8x8xf32>
    %160 = vector.extract_strided_slice %153 {offsets = [0, 0], sizes = [8, 8], strides = [1, 1]} : vector<8x9xf32> to vector<8x8xf32>
    %cst_168 = arith.constant dense<0.000000e+00> : vector<8x8xf32>
    %161 = tpu.matmul %159, %160, %cst_168 {dimension_numbers = #tpu.dot_dimension_numbers<[1], [0], [0], [1], [0, 0, 1, 1], [], []>} : vector<8x8xf32>, vector<8x8xf32>, vector<8x8xf32> -> vector<8x8xf32>
    %c1_169 = arith.constant 1 : index
    %c0_170 = arith.constant 0 : index
    %c0_171 = arith.constant 0 : index
    %162 = vector.load %arg2[%c1_169, %c0_170, %c0_171] : memref<3x8x8xf32, #tpu.memory_space<vmem>>, vector<1x8x8xf32>
    %163 = vector.shape_cast %162 : vector<1x8x8xf32> to vector<8x8xf32>
    %164 = vector.extract_strided_slice %155 {offsets = [0, 0], sizes = [8, 8], strides = [1, 1]} : vector<8x9xf32> to vector<8x8xf32>
    %cst_172 = arith.constant dense<0.000000e+00> : vector<8x8xf32>
    %165 = tpu.matmul %163, %164, %cst_172 {dimension_numbers = #tpu.dot_dimension_numbers<[1], [0], [0], [1], [0, 0, 1, 1], [], []>} : vector<8x8xf32>, vector<8x8xf32>, vector<8x8xf32> -> vector<8x8xf32>
    %166 = arith.addf %161, %165 : vector<8x8xf32>
    %c2_173 = arith.constant 2 : index
    %c0_174 = arith.constant 0 : index
    %c0_175 = arith.constant 0 : index
    %167 = vector.load %arg2[%c2_173, %c0_174, %c0_175] : memref<3x8x8xf32, #tpu.memory_space<vmem>>, vector<1x8x8xf32>
    %168 = vector.shape_cast %167 : vector<1x8x8xf32> to vector<8x8xf32>
    %169 = vector.extract_strided_slice %157 {offsets = [0, 0], sizes = [8, 8], strides = [1, 1]} : vector<8x9xf32> to vector<8x8xf32>
    %cst_176 = arith.constant dense<0.000000e+00> : vector<8x8xf32>
    %170 = tpu.matmul %168, %169, %cst_176 {dimension_numbers = #tpu.dot_dimension_numbers<[1], [0], [0], [1], [0, 0, 1, 1], [], []>} : vector<8x8xf32>, vector<8x8xf32>, vector<8x8xf32> -> vector<8x8xf32>
    %171 = arith.addf %166, %170 : vector<8x8xf32>
    %c0_177 = arith.constant 0 : index
    %c0_178 = arith.constant 0 : index
    %c0_179 = arith.constant 0 : index
    %172 = vector.load %arg3[%c0_177, %c0_178, %c0_179] : memref<3x8x4xf32, #tpu.memory_space<vmem>>, vector<1x8x4xf32>
    %173 = vector.shape_cast %172 : vector<1x8x4xf32> to vector<8x4xf32>
    %174 = vector.extract_strided_slice %153 {offsets = [0, 1], sizes = [4, 8], strides = [1, 1]} : vector<8x9xf32> to vector<4x8xf32>
    %cst_180 = arith.constant dense<0.000000e+00> : vector<8x8xf32>
    %175 = tpu.matmul %173, %174, %cst_180 {dimension_numbers = #tpu.dot_dimension_numbers<[1], [0], [0], [1], [0, 0, 1, 1], [], []>} : vector<8x4xf32>, vector<4x8xf32>, vector<8x8xf32> -> vector<8x8xf32>
    %176 = arith.addf %171, %175 : vector<8x8xf32>
    %c1_181 = arith.constant 1 : index
    %c0_182 = arith.constant 0 : index
    %c0_183 = arith.constant 0 : index
    %177 = vector.load %arg3[%c1_181, %c0_182, %c0_183] : memref<3x8x4xf32, #tpu.memory_space<vmem>>, vector<1x8x4xf32>
    %178 = vector.shape_cast %177 : vector<1x8x4xf32> to vector<8x4xf32>
    %179 = vector.extract_strided_slice %155 {offsets = [0, 1], sizes = [4, 8], strides = [1, 1]} : vector<8x9xf32> to vector<4x8xf32>
    %cst_184 = arith.constant dense<0.000000e+00> : vector<8x8xf32>
    %180 = tpu.matmul %178, %179, %cst_184 {dimension_numbers = #tpu.dot_dimension_numbers<[1], [0], [0], [1], [0, 0, 1, 1], [], []>} : vector<8x4xf32>, vector<4x8xf32>, vector<8x8xf32> -> vector<8x8xf32>
    %181 = arith.addf %176, %180 : vector<8x8xf32>
    %c2_185 = arith.constant 2 : index
    %c0_186 = arith.constant 0 : index
    %c0_187 = arith.constant 0 : index
    %182 = vector.load %arg3[%c2_185, %c0_186, %c0_187] : memref<3x8x4xf32, #tpu.memory_space<vmem>>, vector<1x8x4xf32>
    %183 = vector.shape_cast %182 : vector<1x8x4xf32> to vector<8x4xf32>
    %184 = vector.extract_strided_slice %157 {offsets = [0, 1], sizes = [4, 8], strides = [1, 1]} : vector<8x9xf32> to vector<4x8xf32>
    %cst_188 = arith.constant dense<0.000000e+00> : vector<8x8xf32>
    %185 = tpu.matmul %183, %184, %cst_188 {dimension_numbers = #tpu.dot_dimension_numbers<[1], [0], [0], [1], [0, 0, 1, 1], [], []>} : vector<8x4xf32>, vector<4x8xf32>, vector<8x8xf32> -> vector<8x8xf32>
    %186 = arith.addf %181, %185 : vector<8x8xf32>
    %c0_189 = arith.constant 0 : index
    %c4_190 = arith.constant 4 : index
    %c0_191 = arith.constant 0 : index
    %c0_192 = arith.constant 0 : index
    %187 = vector.load %arg7[%c0_189, %c4_190, %c0_191, %c0_192] : memref<1x8x8x8xf32, #tpu.memory_space<vmem>>, vector<1x1x8x8xf32>
    %188 = vector.shape_cast %187 : vector<1x1x8x8xf32> to vector<8x8xf32>
    %189 = vector.shape_cast %186 : vector<8x8xf32> to vector<1x1x8x8xf32>
    tpu.vector_store %arg7[%c0_189, %c4_190, %c0_191, %c0_192], %189 {strides = array<i32>} : memref<1x8x8x8xf32, #tpu.memory_space<vmem>>, vector<1x1x8x8xf32>,
    %c0_193 = arith.constant 0 : index
    %c5_194 = arith.constant 5 : index
    %c0_195 = arith.constant 0 : index
    %c0_196 = arith.constant 0 : index
    %190 = vector.load %arg4[%c0_193, %c5_194, %c0_195, %c0_196] : memref<1x8x8x9xf32, #tpu.memory_space<vmem>>, vector<1x1x8x9xf32>
    %191 = vector.shape_cast %190 : vector<1x1x8x9xf32> to vector<8x9xf32>
    %c0_197 = arith.constant 0 : index
    %c5_198 = arith.constant 5 : index
    %c0_199 = arith.constant 0 : index
    %c0_200 = arith.constant 0 : index
    %192 = vector.load %arg5[%c0_197, %c5_198, %c0_199, %c0_200] : memref<1x8x8x9xf32, #tpu.memory_space<vmem>>, vector<1x1x8x9xf32>
    %193 = vector.shape_cast %192 : vector<1x1x8x9xf32> to vector<8x9xf32>
    %c0_201 = arith.constant 0 : index
    %c6 = arith.constant 6 : index
    %c0_202 = arith.constant 0 : index
    %c0_203 = arith.constant 0 : index
    %194 = vector.load %arg4[%c0_201, %c6, %c0_202, %c0_203] : memref<1x8x8x9xf32, #tpu.memory_space<vmem>>, vector<1x1x8x9xf32>
    %195 = vector.shape_cast %194 : vector<1x1x8x9xf32> to vector<8x9xf32>
    %c0_204 = arith.constant 0 : index
    %c0_205 = arith.constant 0 : index
    %c0_206 = arith.constant 0 : index
    %196 = vector.load %arg2[%c0_204, %c0_205, %c0_206] : memref<3x8x8xf32, #tpu.memory_space<vmem>>, vector<1x8x8xf32>
    %197 = vector.shape_cast %196 : vector<1x8x8xf32> to vector<8x8xf32>
    %198 = vector.extract_strided_slice %191 {offsets = [0, 0], sizes = [8, 8], strides = [1, 1]} : vector<8x9xf32> to vector<8x8xf32>
    %cst_207 = arith.constant dense<0.000000e+00> : vector<8x8xf32>
    %199 = tpu.matmul %197, %198, %cst_207 {dimension_numbers = #tpu.dot_dimension_numbers<[1], [0], [0], [1], [0, 0, 1, 1], [], []>} : vector<8x8xf32>, vector<8x8xf32>, vector<8x8xf32> -> vector<8x8xf32>
    %c1_208 = arith.constant 1 : index
    %c0_209 = arith.constant 0 : index
    %c0_210 = arith.constant 0 : index
    %200 = vector.load %arg2[%c1_208, %c0_209, %c0_210] : memref<3x8x8xf32, #tpu.memory_space<vmem>>, vector<1x8x8xf32>
    %201 = vector.shape_cast %200 : vector<1x8x8xf32> to vector<8x8xf32>
    %202 = vector.extract_strided_slice %193 {offsets = [0, 0], sizes = [8, 8], strides = [1, 1]} : vector<8x9xf32> to vector<8x8xf32>
    %cst_211 = arith.constant dense<0.000000e+00> : vector<8x8xf32>
    %203 = tpu.matmul %201, %202, %cst_211 {dimension_numbers = #tpu.dot_dimension_numbers<[1], [0], [0], [1], [0, 0, 1, 1], [], []>} : vector<8x8xf32>, vector<8x8xf32>, vector<8x8xf32> -> vector<8x8xf32>
    %204 = arith.addf %199, %203 : vector<8x8xf32>
    %c2_212 = arith.constant 2 : index
    %c0_213 = arith.constant 0 : index
    %c0_214 = arith.constant 0 : index
    %205 = vector.load %arg2[%c2_212, %c0_213, %c0_214] : memref<3x8x8xf32, #tpu.memory_space<vmem>>, vector<1x8x8xf32>
    %206 = vector.shape_cast %205 : vector<1x8x8xf32> to vector<8x8xf32>
    %207 = vector.extract_strided_slice %195 {offsets = [0, 0], sizes = [8, 8], strides = [1, 1]} : vector<8x9xf32> to vector<8x8xf32>
    %cst_215 = arith.constant dense<0.000000e+00> : vector<8x8xf32>
    %208 = tpu.matmul %206, %207, %cst_215 {dimension_numbers = #tpu.dot_dimension_numbers<[1], [0], [0], [1], [0, 0, 1, 1], [], []>} : vector<8x8xf32>, vector<8x8xf32>, vector<8x8xf32> -> vector<8x8xf32>
    %209 = arith.addf %204, %208 : vector<8x8xf32>
    %c0_216 = arith.constant 0 : index
    %c0_217 = arith.constant 0 : index
    %c0_218 = arith.constant 0 : index
    %210 = vector.load %arg3[%c0_216, %c0_217, %c0_218] : memref<3x8x4xf32, #tpu.memory_space<vmem>>, vector<1x8x4xf32>
    %211 = vector.shape_cast %210 : vector<1x8x4xf32> to vector<8x4xf32>
    %212 = vector.extract_strided_slice %191 {offsets = [0, 1], sizes = [4, 8], strides = [1, 1]} : vector<8x9xf32> to vector<4x8xf32>
    %cst_219 = arith.constant dense<0.000000e+00> : vector<8x8xf32>
    %213 = tpu.matmul %211, %212, %cst_219 {dimension_numbers = #tpu.dot_dimension_numbers<[1], [0], [0], [1], [0, 0, 1, 1], [], []>} : vector<8x4xf32>, vector<4x8xf32>, vector<8x8xf32> -> vector<8x8xf32>
    %214 = arith.addf %209, %213 : vector<8x8xf32>
    %c1_220 = arith.constant 1 : index
    %c0_221 = arith.constant 0 : index
    %c0_222 = arith.constant 0 : index
    %215 = vector.load %arg3[%c1_220, %c0_221, %c0_222] : memref<3x8x4xf32, #tpu.memory_space<vmem>>, vector<1x8x4xf32>
    %216 = vector.shape_cast %215 : vector<1x8x4xf32> to vector<8x4xf32>
    %217 = vector.extract_strided_slice %193 {offsets = [0, 1], sizes = [4, 8], strides = [1, 1]} : vector<8x9xf32> to vector<4x8xf32>
    %cst_223 = arith.constant dense<0.000000e+00> : vector<8x8xf32>
    %218 = tpu.matmul %216, %217, %cst_223 {dimension_numbers = #tpu.dot_dimension_numbers<[1], [0], [0], [1], [0, 0, 1, 1], [], []>} : vector<8x4xf32>, vector<4x8xf32>, vector<8x8xf32> -> vector<8x8xf32>
    %219 = arith.addf %214, %218 : vector<8x8xf32>
    %c2_224 = arith.constant 2 : index
    %c0_225 = arith.constant 0 : index
    %c0_226 = arith.constant 0 : index
    %220 = vector.load %arg3[%c2_224, %c0_225, %c0_226] : memref<3x8x4xf32, #tpu.memory_space<vmem>>, vector<1x8x4xf32>
    %221 = vector.shape_cast %220 : vector<1x8x4xf32> to vector<8x4xf32>
    %222 = vector.extract_strided_slice %195 {offsets = [0, 1], sizes = [4, 8], strides = [1, 1]} : vector<8x9xf32> to vector<4x8xf32>
    %cst_227 = arith.constant dense<0.000000e+00> : vector<8x8xf32>
    %223 = tpu.matmul %221, %222, %cst_227 {dimension_numbers = #tpu.dot_dimension_numbers<[1], [0], [0], [1], [0, 0, 1, 1], [], []>} : vector<8x4xf32>, vector<4x8xf32>, vector<8x8xf32> -> vector<8x8xf32>
    %224 = arith.addf %219, %223 : vector<8x8xf32>
    %c0_228 = arith.constant 0 : index
    %c5_229 = arith.constant 5 : index
    %c0_230 = arith.constant 0 : index
    %c0_231 = arith.constant 0 : index
    %225 = vector.load %arg7[%c0_228, %c5_229, %c0_230, %c0_231] : memref<1x8x8x8xf32, #tpu.memory_space<vmem>>, vector<1x1x8x8xf32>
    %226 = vector.shape_cast %225 : vector<1x1x8x8xf32> to vector<8x8xf32>
    %227 = vector.shape_cast %224 : vector<8x8xf32> to vector<1x1x8x8xf32>
    tpu.vector_store %arg7[%c0_228, %c5_229, %c0_230, %c0_231], %227 {strides = array<i32>} : memref<1x8x8x8xf32, #tpu.memory_space<vmem>>, vector<1x1x8x8xf32>,
    %c0_232 = arith.constant 0 : index
    %c6_233 = arith.constant 6 : index
    %c0_234 = arith.constant 0 : index
    %c0_235 = arith.constant 0 : index
    %228 = vector.load %arg4[%c0_232, %c6_233, %c0_234, %c0_235] : memref<1x8x8x9xf32, #tpu.memory_space<vmem>>, vector<1x1x8x9xf32>
    %229 = vector.shape_cast %228 : vector<1x1x8x9xf32> to vector<8x9xf32>
    %c0_236 = arith.constant 0 : index
    %c6_237 = arith.constant 6 : index
    %c0_238 = arith.constant 0 : index
    %c0_239 = arith.constant 0 : index
    %230 = vector.load %arg5[%c0_236, %c6_237, %c0_238, %c0_239] : memref<1x8x8x9xf32, #tpu.memory_space<vmem>>, vector<1x1x8x9xf32>
    %231 = vector.shape_cast %230 : vector<1x1x8x9xf32> to vector<8x9xf32>
    %c0_240 = arith.constant 0 : index
    %c7 = arith.constant 7 : index
    %c0_241 = arith.constant 0 : index
    %c0_242 = arith.constant 0 : index
    %232 = vector.load %arg4[%c0_240, %c7, %c0_241, %c0_242] : memref<1x8x8x9xf32, #tpu.memory_space<vmem>>, vector<1x1x8x9xf32>
    %233 = vector.shape_cast %232 : vector<1x1x8x9xf32> to vector<8x9xf32>
    %c0_243 = arith.constant 0 : index
    %c0_244 = arith.constant 0 : index
    %c0_245 = arith.constant 0 : index
    %234 = vector.load %arg2[%c0_243, %c0_244, %c0_245] : memref<3x8x8xf32, #tpu.memory_space<vmem>>, vector<1x8x8xf32>
    %235 = vector.shape_cast %234 : vector<1x8x8xf32> to vector<8x8xf32>
    %236 = vector.extract_strided_slice %229 {offsets = [0, 0], sizes = [8, 8], strides = [1, 1]} : vector<8x9xf32> to vector<8x8xf32>
    %cst_246 = arith.constant dense<0.000000e+00> : vector<8x8xf32>
    %237 = tpu.matmul %235, %236, %cst_246 {dimension_numbers = #tpu.dot_dimension_numbers<[1], [0], [0], [1], [0, 0, 1, 1], [], []>} : vector<8x8xf32>, vector<8x8xf32>, vector<8x8xf32> -> vector<8x8xf32>
    %c1_247 = arith.constant 1 : index
    %c0_248 = arith.constant 0 : index
    %c0_249 = arith.constant 0 : index
    %238 = vector.load %arg2[%c1_247, %c0_248, %c0_249] : memref<3x8x8xf32, #tpu.memory_space<vmem>>, vector<1x8x8xf32>
    %239 = vector.shape_cast %238 : vector<1x8x8xf32> to vector<8x8xf32>
    %240 = vector.extract_strided_slice %231 {offsets = [0, 0], sizes = [8, 8], strides = [1, 1]} : vector<8x9xf32> to vector<8x8xf32>
    %cst_250 = arith.constant dense<0.000000e+00> : vector<8x8xf32>
    %241 = tpu.matmul %239, %240, %cst_250 {dimension_numbers = #tpu.dot_dimension_numbers<[1], [0], [0], [1], [0, 0, 1, 1], [], []>} : vector<8x8xf32>, vector<8x8xf32>, vector<8x8xf32> -> vector<8x8xf32>
    %242 = arith.addf %237, %241 : vector<8x8xf32>
    %c2_251 = arith.constant 2 : index
    %c0_252 = arith.constant 0 : index
    %c0_253 = arith.constant 0 : index
    %243 = vector.load %arg2[%c2_251, %c0_252, %c0_253] : memref<3x8x8xf32, #tpu.memory_space<vmem>>, vector<1x8x8xf32>
    %244 = vector.shape_cast %243 : vector<1x8x8xf32> to vector<8x8xf32>
    %245 = vector.extract_strided_slice %233 {offsets = [0, 0], sizes = [8, 8], strides = [1, 1]} : vector<8x9xf32> to vector<8x8xf32>
    %cst_254 = arith.constant dense<0.000000e+00> : vector<8x8xf32>
    %246 = tpu.matmul %244, %245, %cst_254 {dimension_numbers = #tpu.dot_dimension_numbers<[1], [0], [0], [1], [0, 0, 1, 1], [], []>} : vector<8x8xf32>, vector<8x8xf32>, vector<8x8xf32> -> vector<8x8xf32>
    %247 = arith.addf %242, %246 : vector<8x8xf32>
    %c0_255 = arith.constant 0 : index
    %c0_256 = arith.constant 0 : index
    %c0_257 = arith.constant 0 : index
    %248 = vector.load %arg3[%c0_255, %c0_256, %c0_257] : memref<3x8x4xf32, #tpu.memory_space<vmem>>, vector<1x8x4xf32>
    %249 = vector.shape_cast %248 : vector<1x8x4xf32> to vector<8x4xf32>
    %250 = vector.extract_strided_slice %229 {offsets = [0, 1], sizes = [4, 8], strides = [1, 1]} : vector<8x9xf32> to vector<4x8xf32>
    %cst_258 = arith.constant dense<0.000000e+00> : vector<8x8xf32>
    %251 = tpu.matmul %249, %250, %cst_258 {dimension_numbers = #tpu.dot_dimension_numbers<[1], [0], [0], [1], [0, 0, 1, 1], [], []>} : vector<8x4xf32>, vector<4x8xf32>, vector<8x8xf32> -> vector<8x8xf32>
    %252 = arith.addf %247, %251 : vector<8x8xf32>
    %c1_259 = arith.constant 1 : index
    %c0_260 = arith.constant 0 : index
    %c0_261 = arith.constant 0 : index
    %253 = vector.load %arg3[%c1_259, %c0_260, %c0_261] : memref<3x8x4xf32, #tpu.memory_space<vmem>>, vector<1x8x4xf32>
    %254 = vector.shape_cast %253 : vector<1x8x4xf32> to vector<8x4xf32>
    %255 = vector.extract_strided_slice %231 {offsets = [0, 1], sizes = [4, 8], strides = [1, 1]} : vector<8x9xf32> to vector<4x8xf32>
    %cst_262 = arith.constant dense<0.000000e+00> : vector<8x8xf32>
    %256 = tpu.matmul %254, %255, %cst_262 {dimension_numbers = #tpu.dot_dimension_numbers<[1], [0], [0], [1], [0, 0, 1, 1], [], []>} : vector<8x4xf32>, vector<4x8xf32>, vector<8x8xf32> -> vector<8x8xf32>
    %257 = arith.addf %252, %256 : vector<8x8xf32>
    %c2_263 = arith.constant 2 : index
    %c0_264 = arith.constant 0 : index
    %c0_265 = arith.constant 0 : index
    %258 = vector.load %arg3[%c2_263, %c0_264, %c0_265] : memref<3x8x4xf32, #tpu.memory_space<vmem>>, vector<1x8x4xf32>
    %259 = vector.shape_cast %258 : vector<1x8x4xf32> to vector<8x4xf32>
    %260 = vector.extract_strided_slice %233 {offsets = [0, 1], sizes = [4, 8], strides = [1, 1]} : vector<8x9xf32> to vector<4x8xf32>
    %cst_266 = arith.constant dense<0.000000e+00> : vector<8x8xf32>
    %261 = tpu.matmul %259, %260, %cst_266 {dimension_numbers = #tpu.dot_dimension_numbers<[1], [0], [0], [1], [0, 0, 1, 1], [], []>} : vector<8x4xf32>, vector<4x8xf32>, vector<8x8xf32> -> vector<8x8xf32>
    %262 = arith.addf %257, %261 : vector<8x8xf32>
    %c0_267 = arith.constant 0 : index
    %c6_268 = arith.constant 6 : index
    %c0_269 = arith.constant 0 : index
    %c0_270 = arith.constant 0 : index
    %263 = vector.load %arg7[%c0_267, %c6_268, %c0_269, %c0_270] : memref<1x8x8x8xf32, #tpu.memory_space<vmem>>, vector<1x1x8x8xf32>
    %264 = vector.shape_cast %263 : vector<1x1x8x8xf32> to vector<8x8xf32>
    %265 = vector.shape_cast %262 : vector<8x8xf32> to vector<1x1x8x8xf32>
    tpu.vector_store %arg7[%c0_267, %c6_268, %c0_269, %c0_270], %265 {strides = array<i32>} : memref<1x8x8x8xf32, #tpu.memory_space<vmem>>, vector<1x1x8x8xf32>,
    %c0_271 = arith.constant 0 : index
    %c7_272 = arith.constant 7 : index
    %c0_273 = arith.constant 0 : index
    %c0_274 = arith.constant 0 : index
    %266 = vector.load %arg4[%c0_271, %c7_272, %c0_273, %c0_274] : memref<1x8x8x9xf32, #tpu.memory_space<vmem>>, vector<1x1x8x9xf32>
    %267 = vector.shape_cast %266 : vector<1x1x8x9xf32> to vector<8x9xf32>
    %c0_275 = arith.constant 0 : index
    %c7_276 = arith.constant 7 : index
    %c0_277 = arith.constant 0 : index
    %c0_278 = arith.constant 0 : index
    %268 = vector.load %arg5[%c0_275, %c7_276, %c0_277, %c0_278] : memref<1x8x8x9xf32, #tpu.memory_space<vmem>>, vector<1x1x8x9xf32>
    %269 = vector.shape_cast %268 : vector<1x1x8x9xf32> to vector<8x9xf32>
    %c0_279 = arith.constant 0 : index
    %c0_280 = arith.constant 0 : index
    %c0_281 = arith.constant 0 : index
    %c0_282 = arith.constant 0 : index
    %270 = vector.load %arg6[%c0_279, %c0_280, %c0_281, %c0_282] : memref<1x1x8x9xf32, #tpu.memory_space<vmem>>, vector<1x1x8x9xf32>
    %271 = vector.shape_cast %270 : vector<1x1x8x9xf32> to vector<8x9xf32>
    %c0_283 = arith.constant 0 : index
    %c0_284 = arith.constant 0 : index
    %c0_285 = arith.constant 0 : index
    %272 = vector.load %arg2[%c0_283, %c0_284, %c0_285] : memref<3x8x8xf32, #tpu.memory_space<vmem>>, vector<1x8x8xf32>
    %273 = vector.shape_cast %272 : vector<1x8x8xf32> to vector<8x8xf32>
    %274 = vector.extract_strided_slice %267 {offsets = [0, 0], sizes = [8, 8], strides = [1, 1]} : vector<8x9xf32> to vector<8x8xf32>
    %cst_286 = arith.constant dense<0.000000e+00> : vector<8x8xf32>
    %275 = tpu.matmul %273, %274, %cst_286 {dimension_numbers = #tpu.dot_dimension_numbers<[1], [0], [0], [1], [0, 0, 1, 1], [], []>} : vector<8x8xf32>, vector<8x8xf32>, vector<8x8xf32> -> vector<8x8xf32>
    %c1_287 = arith.constant 1 : index
    %c0_288 = arith.constant 0 : index
    %c0_289 = arith.constant 0 : index
    %276 = vector.load %arg2[%c1_287, %c0_288, %c0_289] : memref<3x8x8xf32, #tpu.memory_space<vmem>>, vector<1x8x8xf32>
    %277 = vector.shape_cast %276 : vector<1x8x8xf32> to vector<8x8xf32>
    %278 = vector.extract_strided_slice %269 {offsets = [0, 0], sizes = [8, 8], strides = [1, 1]} : vector<8x9xf32> to vector<8x8xf32>
    %cst_290 = arith.constant dense<0.000000e+00> : vector<8x8xf32>
    %279 = tpu.matmul %277, %278, %cst_290 {dimension_numbers = #tpu.dot_dimension_numbers<[1], [0], [0], [1], [0, 0, 1, 1], [], []>} : vector<8x8xf32>, vector<8x8xf32>, vector<8x8xf32> -> vector<8x8xf32>
    %280 = arith.addf %275, %279 : vector<8x8xf32>
    %c2_291 = arith.constant 2 : index
    %c0_292 = arith.constant 0 : index
    %c0_293 = arith.constant 0 : index
    %281 = vector.load %arg2[%c2_291, %c0_292, %c0_293] : memref<3x8x8xf32, #tpu.memory_space<vmem>>, vector<1x8x8xf32>
    %282 = vector.shape_cast %281 : vector<1x8x8xf32> to vector<8x8xf32>
    %283 = vector.extract_strided_slice %271 {offsets = [0, 0], sizes = [8, 8], strides = [1, 1]} : vector<8x9xf32> to vector<8x8xf32>
    %cst_294 = arith.constant dense<0.000000e+00> : vector<8x8xf32>
    %284 = tpu.matmul %282, %283, %cst_294 {dimension_numbers = #tpu.dot_dimension_numbers<[1], [0], [0], [1], [0, 0, 1, 1], [], []>} : vector<8x8xf32>, vector<8x8xf32>, vector<8x8xf32> -> vector<8x8xf32>
    %285 = arith.addf %280, %284 : vector<8x8xf32>
    %c0_295 = arith.constant 0 : index
    %c0_296 = arith.constant 0 : index
    %c0_297 = arith.constant 0 : index
    %286 = vector.load %arg3[%c0_295, %c0_296, %c0_297] : memref<3x8x4xf32, #tpu.memory_space<vmem>>, vector<1x8x4xf32>
    %287 = vector.shape_cast %286 : vector<1x8x4xf32> to vector<8x4xf32>
    %288 = vector.extract_strided_slice %267 {offsets = [0, 1], sizes = [4, 8], strides = [1, 1]} : vector<8x9xf32> to vector<4x8xf32>
    %cst_298 = arith.constant dense<0.000000e+00> : vector<8x8xf32>
    %289 = tpu.matmul %287, %288, %cst_298 {dimension_numbers = #tpu.dot_dimension_numbers<[1], [0], [0], [1], [0, 0, 1, 1], [], []>} : vector<8x4xf32>, vector<4x8xf32>, vector<8x8xf32> -> vector<8x8xf32>
    %290 = arith.addf %285, %289 : vector<8x8xf32>
    %c1_299 = arith.constant 1 : index
    %c0_300 = arith.constant 0 : index
    %c0_301 = arith.constant 0 : index
    %291 = vector.load %arg3[%c1_299, %c0_300, %c0_301] : memref<3x8x4xf32, #tpu.memory_space<vmem>>, vector<1x8x4xf32>
    %292 = vector.shape_cast %291 : vector<1x8x4xf32> to vector<8x4xf32>
    %293 = vector.extract_strided_slice %269 {offsets = [0, 1], sizes = [4, 8], strides = [1, 1]} : vector<8x9xf32> to vector<4x8xf32>
    %cst_302 = arith.constant dense<0.000000e+00> : vector<8x8xf32>
    %294 = tpu.matmul %292, %293, %cst_302 {dimension_numbers = #tpu.dot_dimension_numbers<[1], [0], [0], [1], [0, 0, 1, 1], [], []>} : vector<8x4xf32>, vector<4x8xf32>, vector<8x8xf32> -> vector<8x8xf32>
    %295 = arith.addf %290, %294 : vector<8x8xf32>
    %c2_303 = arith.constant 2 : index
    %c0_304 = arith.constant 0 : index
    %c0_305 = arith.constant 0 : index
    %296 = vector.load %arg3[%c2_303, %c0_304, %c0_305] : memref<3x8x4xf32, #tpu.memory_space<vmem>>, vector<1x8x4xf32>
    %297 = vector.shape_cast %296 : vector<1x8x4xf32> to vector<8x4xf32>
    %298 = vector.extract_strided_slice %271 {offsets = [0, 1], sizes = [4, 8], strides = [1, 1]} : vector<8x9xf32> to vector<4x8xf32>
    %cst_306 = arith.constant dense<0.000000e+00> : vector<8x8xf32>
    %299 = tpu.matmul %297, %298, %cst_306 {dimension_numbers = #tpu.dot_dimension_numbers<[1], [0], [0], [1], [0, 0, 1, 1], [], []>} : vector<8x4xf32>, vector<4x8xf32>, vector<8x8xf32> -> vector<8x8xf32>
    %300 = arith.addf %295, %299 : vector<8x8xf32>
    %c0_307 = arith.constant 0 : index
    %c7_308 = arith.constant 7 : index
    %c0_309 = arith.constant 0 : index
    %c0_310 = arith.constant 0 : index
    %301 = vector.load %arg7[%c0_307, %c7_308, %c0_309, %c0_310] : memref<1x8x8x8xf32, #tpu.memory_space<vmem>>, vector<1x1x8x8xf32>
    %302 = vector.shape_cast %301 : vector<1x1x8x8xf32> to vector<8x8xf32>
    %303 = vector.shape_cast %300 : vector<8x8xf32> to vector<1x1x8x8xf32>
    tpu.vector_store %arg7[%c0_307, %c7_308, %c0_309, %c0_310], %303 {strides = array<i32>} : memref<1x8x8x8xf32, #tpu.memory_space<vmem>>, vector<1x1x8x8xf32>,
    return
  }
  func.func @transform_0(%arg0: i32, %arg1: i32) -> (i32, i32, i32) {
    %c0_i32 = arith.constant 0 : i32
    %c0_i32_0 = arith.constant 0 : i32
    %c0_i32_1 = arith.constant 0 : i32
    %c0_i32_2 = arith.constant 0 : i32
    return %c0_i32, %c0_i32_0, %c0_i32_1 : i32, i32, i32
  }
  func.func @transform_1(%arg0: i32, %arg1: i32) -> (i32, i32, i32) {
    %c0_i32 = arith.constant 0 : i32
    %c0_i32_0 = arith.constant 0 : i32
    %c0_i32_1 = arith.constant 0 : i32
    %c0_i32_2 = arith.constant 0 : i32
    return %c0_i32, %c0_i32_0, %c0_i32_1 : i32, i32, i32
  }
  func.func @transform_2(%arg0: i32, %arg1: i32) -> (i32, i32, i32, i32) {
    %c0_i32 = arith.constant 0 : i32
    %c0_i32_0 = arith.constant 0 : i32
    %c0_i32_1 = arith.constant 0 : i32
    return %arg0, %arg1, %c0_i32, %c0_i32_0 : i32, i32, i32, i32
  }
  func.func @transform_3(%arg0: i32, %arg1: i32) -> (i32, i32, i32, i32) {
    %c0_i32 = arith.constant 0 : i32
    %c0_i32_0 = arith.constant 0 : i32
    %c0_i32_1 = arith.constant 0 : i32
    return %arg0, %arg1, %c0_i32, %c0_i32_0 : i32, i32, i32, i32
  }
  func.func @transform_4(%arg0: i32, %arg1: i32) -> (i32, i32, i32, i32) {
    %c1_i32 = arith.constant 1 : i32
    %0 = arith.addi %arg1, %c1_i32 : i32
    %c8_i32 = arith.constant 8 : i32
    %1 = arith.muli %0, %c8_i32 : i32
    %c0_i32 = arith.constant 0 : i32
    %c0_i32_0 = arith.constant 0 : i32
    %c0_i32_1 = arith.constant 0 : i32
    return %arg0, %1, %c0_i32, %c0_i32_0 : i32, i32, i32, i32
  }
  func.func @transform_5(%arg0: i32, %arg1: i32) -> (i32, i32, i32, i32) {
    %c0_i32 = arith.constant 0 : i32
    %c0_i32_0 = arith.constant 0 : i32
    %c0_i32_1 = arith.constant 0 : i32
    return %arg0, %arg1, %c0_i32, %c0_i32_0 : i32, i32, i32, i32
  }
}

</mosaic_0001>

<bundles_post_ra>
// kernel: tpu_custom_call.1
= control target key start
LH: loop header
LB: loop body
LE: loop exit
PB: predicated region body
PF: predicated region fallthrough
CT: control target
= control target key end

     0   :  { %s5833_s0 = inlined_call_operand.vmem [shape: f32[3,8,8], index: 0, kind: input, shape index: {}]   ;;  %s5834_s1 = inlined_call_operand.vmem [shape: f32[3,8,4], index: 1, kind: input, shape index: {}]   ;;  %s5835_s2 = inlined_call_operand.hbm [shape: f32[2,9,8,9], index: 2, kind: input, shape index: {}]   ;;  %s5836_s3 = inlined_call_operand.hbm [shape: f32[2,8,8,9], index: 3, kind: input, shape index: {}]   ;;  %s5837_s4 = inlined_call_operand.hbm [shape: f32[2,9,8,9], index: 4, kind: input, shape index: {}]   ;;  %s5838_s5 = inlined_call_operand.hbm [shape: f32[2,8,8,8], index: 5, kind: output, shape index: {}]  }
   0x1   :  { %5848 = sst [smem:[#allocation16_spill]] %s5835_s2 }
   0x2   :  { %5849 = sst [smem:[#allocation17_spill]] %s5836_s3 }
   0x3   :  { %10 = vsyncpa [#allocation3], 0 }
   0x4   :  { %12 = vsyncpa [#allocation3 + $0x1], 0 }
   0x5   :  { %13 = vsyncpa [#allocation6], 0 }
   0x6   :  { %15 = vsyncpa [#allocation6 + $0x1], 0 }
   0x7   :  { %16 = vsyncpa [#allocation4], 0 }
   0x8   :  { %18 = vsyncpa [#allocation4 + $0x1], 0  ;;  %s5152_s18 = smov 0   ;;  %s5154_s19 = smov 0  }
   0x9   :  { %s5156_s20 = smov 0   ;;  %s5158_s21 = smov 0  }
   0xa   :  { %s5160_s22 = smov 0   ;;  %s5162_s23 = smov 0  }
   0xb LB: > { %5850 = sst [smem:[#allocation12_spill]] %s5097_s20  ;;  %s5183_s24 = sadd.s32 4294967295, %s5109_s23   ;;  %s5109_s23 = sphi %s5162_s23, %s24_s23   ;;  %s5105_s22 = sphi %s5160_s22, %s5879_s22   ;;  %s5101_s21 = sphi %s5158_s21, %s5878_s21   ;;  %s5097_s20 = sphi %s5156_s20, %s5874_s20   ;;  %s5093_s19 = sphi %s5154_s19, %s5877_s19   ;;  %s5089_s18 = sphi %s5152_s18, %s5876_s18  }
   0xc   : > { %5851 = sst [smem:[#allocation13_spill]] %s5109_s23  ;;  %s4282_s25 = sadd.s32 4294967294, %s5109_s23  }
   0xd   : > { %s36_s26 = sadd.s32 1, %s5105_s22  ;;  %s87_s27 = sadd.s32 1, %s5097_s20 }
   0xe   : > { %p38_p0 = scmp.ge.s32.totalorder %s36_s26, 2  ;;  %p94_p1 = scmp.ne.s32.totalorder %s5097_s20, %s5093_s19 }
   0xf   : > { %p95_p2 = scmp.eq.s32.totalorder %s5109_s23, 0  ;;  %p100_p3 = scmp.ne.s32.totalorder %s5093_s19, %s5089_s18 }
  0x10   : > { %s5881_s26 = smov (%p38_p0, %s36_s26), 0  ;;  %p101_p5 = scmp.eq.s32.totalorder %s5183_s24, 0 }
  0x11   : > { %5852 = sst [smem:[#allocation14_spill]] %s5881_s26  ;;  %p5195_p4 = por %p95_p2, %p94_p1 }
  0x12   : > { %s82_s29 = ssub.s32 %s5105_s22, %s5881_s26  ;;  %p186_p6 = scmp.eq.s32.totalorder %s5183_s24, 1 }
  0x13   : > { %p85_p7 = scmp.eq.s32.totalorder %s82_s29, 0  ;;  %p5203_p8 = por %p101_p5, %p100_p3 }
  0x14   : > { %p5207_p9 = por %p186_p6, %p94_p1  ;;  %p192_p10 = scmp.eq.s32.totalorder %s4282_s25, 1 }
  0x15   : > { %s5854_s30 = scalar_select %p5203_p8, 1, 0 }
  0x16   : > { %s5855_s6 = scalar_select %p5207_p9, 1, 0 }
  0x17   : > { %s5212_s7 = scalar_select %p85_p7, %s5097_s20, %s87_s27  }
  0x18   : > { %p5214_p11 = por %p192_p10, %p100_p3  ;;  %p4875_p13 = scmp.lt.s32.totalorder %s5109_s23, 2 }
  0x19   : > { %5856 = sst [smem:[#allocation15_spill]] %s5212_s7  ;;  %s5221_s9 = sand.u32 1, %s5097_s20  }
  0x1a   : > { %s5857_s8 = scalar_select %p5214_p11, 1, 0 }
  0x1b   : > { %s5839_s10 = sshll.u32 %s5221_s9, 6  ;;  %p5226_p0 = pnand %p4875_p13, %p5195_p4 }
  0x1c   : > { %s247_s12 = sand.u32 1, %s5109_s23   ;;  %s4434_s13 = sshll.u32 %s5105_s22, 10 }
  0x1d   : > { %s5858_s11 = scalar_select %p5226_p0, 1, 0 }
  0x1e   : > { %s251_s14 = scalar_lea.vmem [#allocation5], %s5839_s10  ;;  %s5859_s3 = sld [smem:[#allocation17_spill]] }
  0x1f   : > { %s260_s15 = sshll.u32 %s251_s14, 4  ;;  %s5241_s27 = scalar_lea.sflag [#allocation6], %s247_s12  ;;  %s5239_s15 = int_to_ptr.vmem [resolvable:$true] %s260_s15 }
  0x20   : > { %p5247_p2 = pneg %p5226_p0 }
  0x24   : > { %s5237_s25 = scalar_lea.hbm %s5859_s3, %s4434_s13  ;;  %s4937_s16 = scalar_lea.hbm %s5859_s3, 2048 }
  0x25   : > { %s4932_s28 = scalar_lea.hbm %s5237_s25, 1024  ;;  %p4938_p5 = scmp.lt.u32.totalorder %s5237_s25, %s5859_s3 }
  0x26   : > { %p4933_p1 = scmp.ne.s32.totalorder %s5237_s25, %s4932_s28  ;;  %p4939_p6 = scmp.lt.u32.totalorder %s4937_s16, %s4932_s28 }
  0x27   : > { %p4941_p10 = scmp.lt.u32.totalorder %s4932_s28, %s5237_s25 }
  0x28   : > { %p4935_p3 = pnand %p5247_p2, %p4933_p1  ;;  %p4940_p7 = por %p4939_p6, %p4938_p5 }
  0x2a   : > { %p4936_p4 = pneg %p4935_p3  ;;  %p4942_p13 = por %p4941_p10, %p4940_p7 }
  0x2c   : > { %p4943_p12 = pnand %p4942_p13, %p4936_p4 }
  0x2e   : > { %4946 = shalt.err (!%p4943_p12)
}
  0x2f   : > { %s4947_s12 = scalar_lea.vmem %s5239_s15, 1024  ;;  %s5111_s13 = smov [#allocation5]  }
  0x30   : > { %p4948_p1 = scmp.ne.s32.totalorder %s5239_s15, %s4947_s12  ;;  %s4952_s14 = sshll.u32 %s5111_s13, 4  ;;  %s4953_s14 = int_to_ptr.vmem [resolvable:$false] %s4952_s14 }
  0x31   : > { %s4954_s10 = scalar_lea.vmem %s4953_s14, 2048  ;;  %p4955_p9 = scmp.lt.s32.totalorder %s5239_s15, %s4953_s14 }
  0x32   : > { %p4950_p3 = pnand %p4948_p1, %p5247_p2  ;;  %p4956_p8 = scmp.lt.s32.totalorder %s4954_s10, %s4947_s12 }
  0x34   : > { %p4951_p11 = pneg %p4950_p3  ;;  %p4957_p5 = por %p4956_p8, %p4955_p9 }
  0x36   : > { %p4958_p6 = pnand %p4957_p5, %p4951_p11 }
  0x38   : > { %4961 = shalt.err (!%p4958_p6)
}
  0x39   : > { %s5844_s28 = smov 128   ;;  %s5113_s16 = smov 8  }
  0x3a   : > { %4867 = dma.hbm_to_vmem [thread:$0]  (!%p5226_p0), %s5237_s25, 1024, %s5239_s15, %s5241_s27, %s5844_s28, %s5844_s28, %s5113_s16  }
  0x3b   : > { %p4292_p8 = scmp.ge.s32.totalorder %s5109_s23, 1  ;;  %p290_p9 = scmp.lt.s32.totalorder %s5109_s23, 3 }
  0x3c   : > { %s4852_s12 = smul.u32 1152, %s5105_s22  ;;  %s5862_s13 = sshll.u32 %s5221_s9, 6 }
  0x3d   : > { %p5276_p11 = pnand %p4292_p8, %p290_p9  ;;  %s222_s14 = scalar_lea.vmem [#allocation2], %s5862_s13 }
  0x3e   : > { %s237_s10 = sshll.u32 %s222_s14, 4  ;;  %s5863_s2 = sld [smem:[#allocation16_spill]]  ;;  %s5291_s10 = int_to_ptr.vmem [resolvable:$true] %s237_s10 }
  0x3f   : > { %s5861_s17 = scalar_select %p5276_p11, 1, 0 }
  0x40   : > { %s219_s15 = scalar_lea.sflag [#allocation3], %s5221_s9 }
  0x44   : > { %s5289_s20 = scalar_lea.hbm %s5863_s2, %s4852_s12  ;;  %s4967_s3 = scalar_lea.hbm %s5863_s2, 2304 }
  0x45   : > { %s4962_s25 = scalar_lea.hbm %s5289_s20, 1024  ;;  %p4968_p10 = scmp.lt.u32.totalorder %s5289_s20, %s5863_s2 }
  0x46   : > { %p4963_p12 = scmp.ne.s32.totalorder %s5289_s20, %s4962_s25  ;;  %p4969_p13 = scmp.lt.u32.totalorder %s4967_s3, %s4962_s25 }
  0x47   : > { %p4971_p3 = scmp.lt.u32.totalorder %s4962_s25, %s5289_s20 }
  0x48   : > { %p4965_p4 = pnand %p4963_p12, %p5247_p2  ;;  %p4970_p1 = por %p4969_p13, %p4968_p10 }
  0x4a   : > { %p4966_p7 = pneg %p4965_p4  ;;  %p4972_p5 = por %p4971_p3, %p4970_p1 }
  0x4c   : > { %p4973_p6 = pnand %p4972_p5, %p4966_p7 }
  0x4e   : > { %4976 = shalt.err (!%p4973_p6)
}
  0x4f   : > { %s4977_s7 = scalar_lea.vmem %s5291_s10, 1024  ;;  %s5114_s13 = smov [#allocation2]  }
  0x50   : > { %p4978_p8 = scmp.ne.s32.totalorder %s5291_s10, %s4977_s7  ;;  %s4982_s14 = sshll.u32 %s5114_s13, 4  ;;  %s4983_s14 = int_to_ptr.vmem [resolvable:$false] %s4982_s14 }
  0x51   : > { %s4984_s28 = scalar_lea.vmem %s4983_s14, 2048  ;;  %p4985_p4 = scmp.lt.s32.totalorder %s5291_s10, %s4983_s14 }
  0x52   : > { %p4980_p9 = pnand %p4978_p8, %p5247_p2  ;;  %p4986_p11 = scmp.lt.s32.totalorder %s4984_s28, %s4977_s7 }
  0x54   : > { %p4981_p12 = pneg %p4980_p9  ;;  %p4987_p10 = por %p4986_p11, %p4985_p4 }
  0x56   : > { %p4988_p13 = pnand %p4987_p10, %p4981_p12 }
  0x58   : > { %4991 = shalt.err (!%p4988_p13)
}
  0x59   : > { %s5864_s3 = smov 128   ;;  %s4197_s7 = scalar_lea.hbm %s5837_s4, %s4852_s12 }
  0x5a   : > { %4864 = dma.hbm_to_vmem [thread:$0]  (!%p5226_p0), %s5289_s20, 1024, %s5291_s10, %s219_s15, %s5864_s3, %s5864_s3, %s5113_s16  }
  0x5b   : > { %s5325_s13 = scalar_lea.hbm %s4197_s7, 1024  ;;  %s5865_s14 = sshll.u32 %s5221_s9, 3 }
  0x5c   : > { %s274_s28 = scalar_lea.vmem [#allocation7], %s5865_s14  ;;  %s5022_s23 = scalar_lea.hbm %s4197_s7, 1152 }
  0x5d   : > { %s285_s2 = sshll.u32 %s274_s28, 4  ;;  %p4993_p11 = scmp.ne.s32.totalorder %s5325_s13, %s5022_s23  ;;  %s286_s2 = int_to_ptr.vmem [resolvable:$true] %s285_s2 }
  0x5e   : > { %s4997_s10 = scalar_lea.hbm %s5837_s4, 2304  ;;  %p4998_p3 = scmp.lt.u32.totalorder %s5325_s13, %s5837_s4 }
  0x5f   : > { %p4995_p7 = pnand %p4993_p11, %p5247_p2  ;;  %p4999_p5 = scmp.lt.u32.totalorder %s4997_s10, %s5022_s23 }
  0x60   : > { %p5001_p8 = scmp.lt.u32.totalorder %s5022_s23, %s5325_s13 }
  0x61   : > { %p4996_p1 = pneg %p4995_p7  ;;  %p5000_p6 = por %p4999_p5, %p4998_p3 }
  0x63   : > { %p5002_p9 = por %p5001_p8, %p5000_p6 }
  0x65   : > { %p5003_p12 = pnand %p5002_p9, %p4996_p1 }
  0x67   : > { %5006 = shalt.err (!%p5003_p12)
}
  0x68   : > { %s5007_s9 = scalar_lea.vmem %s286_s2, 128  ;;  %s5115_s3 = smov [#allocation7]  }
  0x69   : > { %p5008_p4 = scmp.ne.s32.totalorder %s286_s2, %s5007_s9  ;;  %s5012_s25 = sshll.u32 %s5115_s3, 4  ;;  %s5013_s25 = int_to_ptr.vmem [resolvable:$false] %s5012_s25 }
  0x6a   : > { %s5014_s26 = scalar_lea.vmem %s5013_s25, 256  ;;  %p5015_p11 = scmp.lt.s32.totalorder %s286_s2, %s5013_s25 }
  0x6b   : > { %p5010_p10 = pnand %p5008_p4, %p5247_p2  ;;  %p5016_p7 = scmp.lt.s32.totalorder %s5014_s26, %s5007_s9 }
  0x6d   : > { %p5011_p13 = pneg %p5010_p10  ;;  %p5017_p0 = por %p5016_p7, %p5015_p11 }
  0x6f   : > { %p5018_p3 = pnand %p5017_p0, %p5011_p13 }
  0x71   : > { %5021 = shalt.err (!%p5018_p3)
}
  0x72   : > { %p5866_p5 = scmp.ne.s32.totalorder %s5858_s11, 0  ;;  %p5867_p1 = scmp.ne.s32.totalorder %s5861_s17, 0 }
  0x73   : > { %s5349_s23 = sand.u32 (!%p5867_p1), 1, %s5093_s19   ;;  %p5868_p0 = scmp.ne.s32.totalorder (!%p5867_p1), %s5854_s30, 0 }
  0x74   : > { %4870 = dma.hbm_to_vmem [thread:$0]  (!%p5866_p5), %s5325_s13, 128, %s286_s2, %s5241_s27  }
  0x75   : > { %294 = sbr.rel (%p5867_p1) target bundleno = 626 (0x272), region = 40  ;;  %s5352_s29 = sshll.u32 (!%p5867_p1), %s5349_s23, 6 }
  0x76   : > { %s297_s7 = scalar_lea.sflag (!%p5867_p1), [#allocation3], %s5349_s23  ;;  %s5356_s14 = scalar_lea.vmem (!%p5867_p1), [#allocation2], %s5352_s29 }
  0x7c   : > { %5076 = dma.done.wait (%p5868_p0), %s297_s7, 1024  }
  0x7d   : > { %5078 = vsyncadd (%p5868_p0), %s297_s7, 4294966272  ;;  %s305_s2 = sand.u32 1, %s5183_s24   ;;  %s5364_s27 = scalar_lea.vmem [#allocation5], %s5352_s29 }
  0x7e   : > { %s306_s11 = scalar_lea.sflag [#allocation6], %s305_s2 }
  0x7f   : > { %5080 = dma.done.wait (%p5868_p0), %s306_s11, 1152  }
  0x80   : > { %5082 = vsyncadd (%p5868_p0), %s306_s11, 4294966144  ;;  %v5116_v0 = vmov 0.0   ;;  %vm5117_vm0 = vmmov 0   ;;  %v364_v1 = vld [vmem:[%s5356_s14] sm:$0xff]  ;;  %s5118_s24 = smov 127   ;;  %v4312_v3 = vld [vmem:[%s5364_s27 + $0x8] sm:$0xff] }
  0x81   : > { %4532 = vmatprep.subr.mxu0 %v5116_v0  ;;  %4534 = vmatprep.mubr.msk.f32.mxu0 %vm5117_vm0, %v5116_v0  ;;  %v365_v2 = vld [vmem:[%s5364_s27] sm:$0xff]  ;;  %vm371_vm1 = vcmask 64512   ;;  %v4311_v4 = vld [vmem:[%s5356_s14 + $0x8] sm:$0xff]  ;;  %v5396_v6 = vld [vmem:[%s5356_s14 + $0x10] sm:$0xff]  ;;  %s4295_s10 = sshll.u32 %s5349_s23, 3  ;;  %vm602_vm2 = vcmask 1043456  }
  0x82   : > { %4562 = vmatprep.subr.mxu1 %v5116_v0  ;;  %4564 = vmatprep.mubr.msk.f32.mxu1 %vm5117_vm0, %v5116_v0  ;;  %v5385_v5 = vld [vmem:[%s5833_s0 + $0x8] sm:$0xff]  ;;  %v5410_v7 = vld [vmem:[%s5833_s0] sm:$0xff]  ;;  %v5413_v8 = vld [vmem:[%s5356_s14 + $0x18] sm:$0xff]  ;;  %s318_s15 = scalar_lea.vmem [#allocation7], %s4295_s10  ;;  %vm598_vm3 = vcmask 31744   ;;  %s4435_s2 = sshll.u32 %s5101_s21, 10 }
  0x83   : > { %596 = vrot.lane.b32.xlu0 %v364_v1, %s5118_s24  ;;  %679 = vrot.lane.b32.xlu1 %v365_v2, %s5118_s24  ;;  %v5424_v9 = vld [vmem:[%s5364_s27 + $0x10] sm:$0xff]  ;;  %v5427_v10 = vld [vmem:[%s5364_s27 + $0x18] sm:$0xff]  ;;  %s4129_s30 = scalar_lea.sflag [#allocation4], %s5349_s23  ;;  %p5869_p6 = scmp.ne.s32.totalorder %s5855_s6, 0 }
  0x84   : > { %4533 = vmatpush3.msra.mxu0 %v365_v2  ;;  %4563 = vmatpush3.msra.mxu1 %v4312_v3  ;;  %v5443_v11 = vld [vmem:[%s5833_s0 + $0x10] sm:$0xff]  ;;  %v5446_v12 = vld [vmem:[%s5356_s14 + $0x20] sm:$0xff]  ;;  %v5457_v13 = vld [vmem:[%s5356_s14 + $0x28] sm:$0xff]  ;;  %s5119_s17 = smov [#allocation8]  }
  0x85   : > { %4537 = vmatprep.subr.mxu0 %v5116_v0  ;;  %4567 = vmatprep.subr.mxu1 %v5116_v0  ;;  %v5468_v14 = vld [vmem:[%s5364_s27 + $0x20] sm:$0xff]  ;;  %v5471_v15 = vld [vmem:[%s5364_s27 + $0x28] sm:$0xff]  ;;  %v5478_v16 = vld [vmem:[%s5356_s14 + $0x30] sm:$0xff]  ;;  %s5027_s13 = sshll.u32 %s5119_s17, 4  ;;  %s5028_s13 = int_to_ptr.vmem [resolvable:$false] %s5027_s13 }
  0x86   : > { %4535 = vmatmul.mubr.msk.f32.vlgmr.msra.gmra.mrb[0].mxu0 %vm371_vm1, %v5385_v5  ;;  %4565 = vmatmul.mubr.msk.f32.vlgmr.msra.gmra.mrb[0].mxu1 %vm371_vm1, %v5385_v5  ;;  %v5485_v17 = vld [vmem:[%s5356_s14 + $0x38] sm:$0xff]  ;;  %v5493_v18 = vld [vmem:[%s5364_s27 + $0x30] sm:$0xff]  ;;  %v5502_v20 = vld [vmem:[%s318_s15] sm:$0xff]  ;;  %s354_s14 = scalar_lea.vmem [#allocation8], %s5352_s29  ;;  %s5029_s28 = scalar_lea.vmem %s5028_s13, 2048 }
  0x87   : > { %1069 = vrot.lane.b32.xlu0 %v4311_v4, %s5118_s24  ;;  %1149 = vrot.lane.b32.xlu1 %v4312_v3, %s5118_s24  ;;  %v5496_v19 = vld [vmem:[%s5364_s27 + $0x38] sm:$0xff]  ;;  %v5511_v21 = vld [vmem:[%s5834_s1] sm:$0xff]  ;;  %s4144_s29 = sshll.u32 %s354_s14, 4  ;;  %s5777_s29 = int_to_ptr.vmem [resolvable:$true] %s4144_s29 }
  0x88   : > { %4538 = vmatpush3.msra.mxu0 %v364_v1  ;;  %4539 = vmatprep.mubr.msk.f32.mxu0 %vm5117_vm0, %v5116_v0  ;;  %v5528_v26 = vld [vmem:[%s5834_s1 + $0x8] sm:$0xff]  ;;  %v5545_v29 = vld [vmem:[%s5834_s1 + $0x10] sm:$0xff]  ;;  %s5023_s21 = scalar_lea.vmem %s5777_s29, 1024  ;;  %p5030_p12 = scmp.lt.s32.totalorder %s5777_s29, %s5028_s13 }
  0x89   : > { %4568 = vmatpush3.msra.mxu1 %v4311_v4  ;;  %4569 = vmatprep.mubr.msk.f32.mxu1 %vm5117_vm0, %v5116_v0  ;;  %p5024_p2 = scmp.ne.s32.totalorder %s5777_s29, %s5023_s21  ;;  %p5031_p4 = scmp.lt.s32.totalorder %s5029_s28, %s5023_s21 }
  0x8a   : > { %4542 = vmatprep.subr.mxu0 %v5116_v0  ;;  %4572 = vmatprep.subr.mxu1 %v5116_v0 }
  0x8b   : > { %760 = vrot.lane.b32.xlu0 %v4311_v4, %s5118_s24  ;;  %1229 = vrot.lane.b32.xlu1 %v5396_v6, %s5118_s24  ;;  %p5025_p8 = pnand %p5024_p2, %p5869_p6  ;;  %p5032_p10 = por %p5031_p4, %p5030_p12 }
  0x8d   : > { %p5026_p9 = pneg %p5025_p8 }
  0x8e   : > { %4540 = vmatmul.mubr.msk.f32.vlgmr.msra.gmra.mrb[0].mxu0 %vm371_vm1, %v5410_v7  ;;  %4570 = vmatmul.mubr.msk.f32.vlgmr.msra.gmra.mrb[0].mxu1 %vm371_vm1, %v5410_v7 }
  0x8f   : > { %1539 = vrot.lane.b32.xlu0 %v5396_v6, %s5118_s24  ;;  %2009 = vrot.lane.b32.xlu1 %v5413_v8, %s5118_s24  ;;  %p5033_p13 = pnand %p5032_p10, %p5026_p9 }
  0x90   : > { %4543 = vmatpush3.msra.mxu0 %v4311_v4  ;;  %4544 = vmatprep.mubr.msk.f32.mxu0 %vm5117_vm0, %v5116_v0 }
  0x91   : > { %4573 = vmatpush3.msra.mxu1 %v5396_v6  ;;  %4574 = vmatprep.mubr.msk.f32.mxu1 %vm5117_vm0, %v5116_v0 }
  0x92   : > { %4547 = vmatprep.subr.mxu0 %v5116_v0  ;;  %4577 = vmatprep.subr.mxu1 %v5116_v0 }
  0x93   : > { %1619 = vrot.lane.b32.xlu0 %v5424_v9, %s5118_s24  ;;  %2089 = vrot.lane.b32.xlu1 %v5427_v10, %s5118_s24 }
  0x96   : > { %4545 = vmatmul.mubr.msk.f32.vlgmr.msra.gmra.mrb[0].mxu0 %vm371_vm1, %v5443_v11  ;;  %4575 = vmatmul.mubr.msk.f32.vlgmr.msra.gmra.mrb[0].mxu1 %vm371_vm1, %v5443_v11 }
  0x97   : > { %1699 = vrot.lane.b32.xlu0 %v5413_v8, %s5118_s24  ;;  %2169 = vrot.lane.b32.xlu1 %v5446_v12, %s5118_s24 }
  0x98   : > { %4549 = vmatprep.mubr.msk.f32.mxu0 %vm5117_vm0, %v5116_v0  ;;  %4579 = vmatprep.mubr.msk.f32.mxu1 %vm5117_vm0, %v5116_v0 }
  0x9b   : > { %2479 = vrot.lane.b32.xlu0 %v5446_v12, %s5118_s24  ;;  %2949 = vrot.lane.b32.xlu1 %v5457_v13, %s5118_s24 }
  0x9f   : > { %2559 = vrot.lane.b32.xlu0 %v5468_v14, %s5118_s24  ;;  %3029 = vrot.lane.b32.xlu1 %v5471_v15, %s5118_s24 }
  0xa3   : > { %2639 = vrot.lane.b32.xlu0 %v5457_v13, %s5118_s24  ;;  %3109 = vrot.lane.b32.xlu1 %v5478_v16, %s5118_s24 }
  0xa7   : > { %3419 = vrot.lane.b32.xlu0 %v5478_v16, %s5118_s24  ;;  %3888 = vrot.lane.b32.xlu1 %v5485_v17, %s5118_s24 }
  0xab   : > { %3499 = vrot.lane.b32.xlu0 %v5493_v18, %s5118_s24  ;;  %3968 = vrot.lane.b32.xlu1 %v5496_v19, %s5118_s24 }
  0xaf   : > { %3579 = vrot.lane.b32.xlu0 %v5485_v17, %s5118_s24  ;;  %4048 = vrot.lane.b32.xlu1 %v5502_v20, %s5118_s24  ;;  %s5783_s24 = scalar_lea.hbm %s5838_s5, %s4435_s2 }
  0xf5   : > { %v597_v22 = vpop.permute.xlu0 %596  ;;  %v680_v23 = vpop.permute.xlu1 %679 }
  0xf6   : > { %4548 = vmatpush3.msk.msra.mxu0 %vm602_vm2, %v597_v22 }
  0xf7   : > { %4550 = vmatmul.mubr.msk.f32.vlgmr.msra.gmra.mrb[0].mxu0 %vm598_vm3, %v5511_v21  ;;  %4552 = vmatprep.subr.mxu0 %v5116_v0 }
  0xf8   : > { %4553 = vmatpush3.msk.msra.mxu0 %vm602_vm2, %v680_v23  ;;  %4554 = vmatprep.mubr.msk.f32.mxu0 %vm5117_vm0, %v5116_v0 }
  0xf9   : > { %v1070_v24 = vpop.permute.xlu0 %1069  ;;  %v1150_v25 = vpop.permute.xlu1 %1149  ;;  %4557 = vmatprep.subr.mxu0 %v5116_v0 }
  0xfa   : > { %4578 = vmatpush3.msk.msra.mxu1 %vm602_vm2, %v1070_v24 }
  0xfb   : > { %4580 = vmatmul.mubr.msk.f32.vlgmr.msra.gmra.mrb[0].mxu1 %vm598_vm3, %v5511_v21  ;;  %4582 = vmatprep.subr.mxu1 %v5116_v0 }
  0xfc   : > { %4583 = vmatpush3.msk.msra.mxu1 %vm602_vm2, %v1150_v25  ;;  %4584 = vmatprep.mubr.msk.f32.mxu1 %vm5117_vm0, %v5116_v0 }
  0xfd   : > { %v761_v27 = vpop.permute.xlu0 %760  ;;  %4587 = vmatprep.subr.mxu1 %v5116_v0  ;;  %v1230_v28 = vpop.permute.xlu1 %1229 }
  0xff   : > { %4555 = vmatmul.mubr.msk.f32.vlgmr.msra.gmra.mrb[0].mxu0 %vm598_vm3, %v5528_v26 }
 0x100   : > { %4558 = vmatpush3.msk.msra.mxu0 %vm602_vm2, %v761_v27  ;;  %4559 = vmatprep.mubr.msk.f32.mxu0 %vm5117_vm0, %v5116_v0 }
 0x101   : > { %4592 = vmatprep.subr.mxu0 %v5116_v0  ;;  %v1540_v30 = vpop.permute.xlu0 %1539  ;;  %v2010_v31 = vpop.permute.xlu1 %2009 }
 0x103   : > { %4585 = vmatmul.mubr.msk.f32.vlgmr.msra.gmra.mrb[0].mxu1 %vm598_vm3, %v5528_v26 }
 0x104   : > { %4588 = vmatpush3.msk.msra.mxu1 %vm602_vm2, %v1230_v28  ;;  %4589 = vmatprep.mubr.msk.f32.mxu1 %vm5117_vm0, %v5116_v0 }
 0x105   : > { %4622 = vmatprep.subr.mxu1 %v5116_v0  ;;  %v1620_v32 = vpop.permute.xlu0 %1619  ;;  %v2090_v33 = vpop.permute.xlu1 %2089 }
 0x107   : > { %4560 = vmatmul.mubr.msk.f32.vlgmr.msra.gmra.mrb[0].mxu0 %vm598_vm3, %v5545_v29 }
 0x108   : > { %4593 = vmatpush3.msra.mxu0 %v5424_v9  ;;  %4594 = vmatprep.mubr.msk.f32.mxu0 %vm5117_vm0, %v5116_v0 }
 0x109   : > { %4597 = vmatprep.subr.mxu0 %v5116_v0  ;;  %v1700_v34 = vpop.permute.xlu0 %1699  ;;  %v2170_v35 = vpop.permute.xlu1 %2169 }
 0x10b   : > { %4590 = vmatmul.mubr.msk.f32.vlgmr.msra.gmra.mrb[0].mxu1 %vm598_vm3, %v5545_v29  ;;  %4595 = vmatmul.mubr.msk.f32.vlgmr.msra.gmra.mrb[2].mxu0 %vm371_vm1, %v5385_v5 }
 0x10c   : > { %4623 = vmatpush3.msra.mxu1 %v5427_v10  ;;  %4624 = vmatprep.mubr.msk.f32.mxu1 %vm5117_vm0, %v5116_v0 }
 0x10d   : > { %4598 = vmatpush3.msra.mxu0 %v5396_v6  ;;  %4599 = vmatprep.mubr.msk.f32.mxu0 %vm5117_vm0, %v5116_v0  ;;  %v2480_v36 = vpop.permute.xlu0 %2479  ;;  %v2950_v37 = vpop.permute.xlu1 %2949 }
 0x10e   : > { %4627 = vmatprep.subr.mxu1 %v5116_v0  ;;  %4602 = vmatprep.subr.mxu0 %v5116_v0 }
 0x10f   : > { %4625 = vmatmul.mubr.msk.f32.vlgmr.msra.gmra.mrb[2].mxu1 %vm371_vm1, %v5385_v5 }
 0x110   : > { %4628 = vmatpush3.msra.mxu1 %v5413_v8  ;;  %4629 = vmatprep.mubr.msk.f32.mxu1 %vm5117_vm0, %v5116_v0 }
 0x111   : > { %4632 = vmatprep.subr.mxu1 %v5116_v0  ;;  %v2560_v38 = vpop.permute.xlu0 %2559  ;;  %v3030_v39 = vpop.permute.xlu1 %3029 }
 0x113   : > { %4600 = vmatmul.mubr.msk.f32.vlgmr.msra.gmra.mrb[2].mxu0 %vm371_vm1, %v5410_v7 }
 0x114   : > { %4603 = vmatpush3.msra.mxu0 %v5413_v8  ;;  %4604 = vmatprep.mubr.msk.f32.mxu0 %vm5117_vm0, %v5116_v0 }
 0x115   : > { %4607 = vmatprep.subr.mxu0 %v5116_v0  ;;  %v2640_v40 = vpop.permute.xlu0 %2639  ;;  %v3110_v41 = vpop.permute.xlu1 %3109 }
 0x117   : > { %4630 = vmatmul.mubr.msk.f32.vlgmr.msra.gmra.mrb[2].mxu1 %vm371_vm1, %v5410_v7 }
 0x118   : > { %4633 = vmatpush3.msra.mxu1 %v5446_v12  ;;  %4634 = vmatprep.mubr.msk.f32.mxu1 %vm5117_vm0, %v5116_v0 }
 0x119   : > { %4637 = vmatprep.subr.mxu1 %v5116_v0  ;;  %v3420_v42 = vpop.permute.xlu0 %3419  ;;  %v3889_v43 = vpop.permute.xlu1 %3888 }
 0x11b   : > { %4605 = vmatmul.mubr.msk.f32.vlgmr.msra.gmra.mrb[2].mxu0 %vm371_vm1, %v5443_v11 }
 0x11c   : > { %4608 = vmatpush3.msk.msra.mxu0 %vm602_vm2, %v1540_v30  ;;  %4609 = vmatprep.mubr.msk.f32.mxu0 %vm5117_vm0, %v5116_v0 }
 0x11d   : > { %4612 = vmatprep.subr.mxu0 %v5116_v0  ;;  %v3500_v44 = vpop.permute.xlu0 %3499  ;;  %v3969_v45 = vpop.permute.xlu1 %3968 }
 0x11f   : > { %4635 = vmatmul.mubr.msk.f32.vlgmr.msra.gmra.mrb[2].mxu1 %vm371_vm1, %v5443_v11 }
 0x120   : > { %4638 = vmatpush3.msk.msra.mxu1 %vm602_vm2, %v2010_v31  ;;  %4639 = vmatprep.mubr.msk.f32.mxu1 %vm5117_vm0, %v5116_v0 }
 0x121   : > { %4642 = vmatprep.subr.mxu1 %v5116_v0  ;;  %v3580_v46 = vpop.permute.xlu0 %3579  ;;  %v4049_v47 = vpop.permute.xlu1 %4048 }
 0x123   : > { %4610 = vmatmul.mubr.msk.f32.vlgmr.msra.gmra.mrb[2].mxu0 %vm598_vm3, %v5511_v21 }
 0x124   : > { %4613 = vmatpush3.msk.msra.mxu0 %vm602_vm2, %v1620_v32  ;;  %4614 = vmatprep.mubr.msk.f32.mxu0 %vm5117_vm0, %v5116_v0 }
 0x125   : > { %4617 = vmatprep.subr.mxu0 %v5116_v0 }
 0x127   : > { %4640 = vmatmul.mubr.msk.f32.vlgmr.msra.gmra.mrb[2].mxu1 %vm598_vm3, %v5511_v21 }
 0x128   : > { %4643 = vmatpush3.msk.msra.mxu1 %vm602_vm2, %v2090_v33  ;;  %4644 = vmatprep.mubr.msk.f32.mxu1 %vm5117_vm0, %v5116_v0 }
 0x129   : > { %4647 = vmatprep.subr.mxu1 %v5116_v0 }
 0x12b   : > { %4615 = vmatmul.mubr.msk.f32.vlgmr.msra.gmra.mrb[2].mxu0 %vm598_vm3, %v5528_v26 }
 0x12c   : > { %4618 = vmatpush3.msk.msra.mxu0 %vm602_vm2, %v1700_v34  ;;  %4619 = vmatprep.mubr.msk.f32.mxu0 %vm5117_vm0, %v5116_v0 }
 0x12d   : > { %4652 = vmatprep.subr.mxu0 %v5116_v0 }
 0x12f   : > { %4645 = vmatmul.mubr.msk.f32.vlgmr.msra.gmra.mrb[2].mxu1 %vm598_vm3, %v5528_v26 }
 0x130   : > { %4648 = vmatpush3.msk.msra.mxu1 %vm602_vm2, %v2170_v35  ;;  %4649 = vmatprep.mubr.msk.f32.mxu1 %vm5117_vm0, %v5116_v0 }
 0x131   : > { %4682 = vmatprep.subr.mxu1 %v5116_v0 }
 0x133   : > { %4620 = vmatmul.mubr.msk.f32.vlgmr.msra.gmra.mrb[2].mxu0 %vm598_vm3, %v5545_v29 }
 0x134   : > { %4653 = vmatpush3.msra.mxu0 %v5468_v14  ;;  %4654 = vmatprep.mubr.msk.f32.mxu0 %vm5117_vm0, %v5116_v0 }
 0x135   : > { %4657 = vmatprep.subr.mxu0 %v5116_v0 }
 0x137   : > { %4650 = vmatmul.mubr.msk.f32.vlgmr.msra.gmra.mrb[2].mxu1 %vm598_vm3, %v5545_v29  ;;  %4655 = vmatmul.mubr.msk.f32.vlgmr.msra.gmra.mrb[4].mxu0 %vm371_vm1, %v5385_v5 }
 0x138   : > { %4683 = vmatpush3.msra.mxu1 %v5471_v15  ;;  %4684 = vmatprep.mubr.msk.f32.mxu1 %vm5117_vm0, %v5116_v0 }
 0x139   : > { %4658 = vmatpush3.msra.mxu0 %v5446_v12  ;;  %4659 = vmatprep.mubr.msk.f32.mxu0 %vm5117_vm0, %v5116_v0 }
 0x13a   : > { %4687 = vmatprep.subr.mxu1 %v5116_v0  ;;  %4662 = vmatprep.subr.mxu0 %v5116_v0 }
 0x13b   : > { %4685 = vmatmul.mubr.msk.f32.vlgmr.msra.gmra.mrb[4].mxu1 %vm371_vm1, %v5385_v5 }
 0x13c   : > { %4688 = vmatpush3.msra.mxu1 %v5457_v13  ;;  %4689 = vmatprep.mubr.msk.f32.mxu1 %vm5117_vm0, %v5116_v0 }
 0x13d   : > { %4692 = vmatprep.subr.mxu1 %v5116_v0 }
 0x13f   : > { %4660 = vmatmul.mubr.msk.f32.vlgmr.msra.gmra.mrb[4].mxu0 %vm371_vm1, %v5410_v7 }
 0x140   : > { %4663 = vmatpush3.msra.mxu0 %v5457_v13  ;;  %4664 = vmatprep.mubr.msk.f32.mxu0 %vm5117_vm0, %v5116_v0 }
 0x141   : > { %4667 = vmatprep.subr.mxu0 %v5116_v0 }
 0x143   : > { %4690 = vmatmul.mubr.msk.f32.vlgmr.msra.gmra.mrb[4].mxu1 %vm371_vm1, %v5410_v7 }
 0x144   : > { %4693 = vmatpush3.msra.mxu1 %v5478_v16  ;;  %4694 = vmatprep.mubr.msk.f32.mxu1 %vm5117_vm0, %v5116_v0 }
 0x145   : > { %4697 = vmatprep.subr.mxu1 %v5116_v0 }
 0x147   : > { %4665 = vmatmul.mubr.msk.f32.vlgmr.msra.gmra.mrb[4].mxu0 %vm371_vm1, %v5443_v11 }
 0x148   : > { %4668 = vmatpush3.msk.msra.mxu0 %vm602_vm2, %v2480_v36  ;;  %4669 = vmatprep.mubr.msk.f32.mxu0 %vm5117_vm0, %v5116_v0 }
 0x149   : > { %4672 = vmatprep.subr.mxu0 %v5116_v0 }
 0x14b   : > { %4695 = vmatmul.mubr.msk.f32.vlgmr.msra.gmra.mrb[4].mxu1 %vm371_vm1, %v5443_v11 }
 0x14c   : > { %4698 = vmatpush3.msk.msra.mxu1 %vm602_vm2, %v2950_v37  ;;  %4699 = vmatprep.mubr.msk.f32.mxu1 %vm5117_vm0, %v5116_v0 }
 0x14d   : > { %4702 = vmatprep.subr.mxu1 %v5116_v0 }
 0x14f   : > { %4670 = vmatmul.mubr.msk.f32.vlgmr.msra.gmra.mrb[4].mxu0 %vm598_vm3, %v5511_v21 }
 0x150   : > { %4673 = vmatpush3.msk.msra.mxu0 %vm602_vm2, %v2560_v38  ;;  %4674 = vmatprep.mubr.msk.f32.mxu0 %vm5117_vm0, %v5116_v0 }
 0x151   : > { %4677 = vmatprep.subr.mxu0 %v5116_v0 }
 0x153   : > { %4700 = vmatmul.mubr.msk.f32.vlgmr.msra.gmra.mrb[4].mxu1 %vm598_vm3, %v5511_v21 }
 0x154   : > { %4703 = vmatpush3.msk.msra.mxu1 %vm602_vm2, %v3030_v39  ;;  %4704 = vmatprep.mubr.msk.f32.mxu1 %vm5117_vm0, %v5116_v0 }
 0x155   : > { %4707 = vmatprep.subr.mxu1 %v5116_v0 }
 0x157   : > { %4675 = vmatmul.mubr.msk.f32.vlgmr.msra.gmra.mrb[4].mxu0 %vm598_vm3, %v5528_v26 }
 0x158   : > { %4678 = vmatpush3.msk.msra.mxu0 %vm602_vm2, %v2640_v40  ;;  %4679 = vmatprep.mubr.msk.f32.mxu0 %vm5117_vm0, %v5116_v0 }
 0x159   : > { %4712 = vmatprep.subr.mxu0 %v5116_v0 }
 0x15b   : > { %4705 = vmatmul.mubr.msk.f32.vlgmr.msra.gmra.mrb[4].mxu1 %vm598_vm3, %v5528_v26 }
 0x15c   : > { %4708 = vmatpush3.msk.msra.mxu1 %vm602_vm2, %v3110_v41  ;;  %4709 = vmatprep.mubr.msk.f32.mxu1 %vm5117_vm0, %v5116_v0 }
 0x15d   : > { %4742 = vmatprep.subr.mxu1 %v5116_v0 }
 0x15f   : > { %4680 = vmatmul.mubr.msk.f32.vlgmr.msra.gmra.mrb[4].mxu0 %vm598_vm3, %v5545_v29 }
 0x160   : > { %4713 = vmatpush3.msra.mxu0 %v5493_v18  ;;  %4714 = vmatprep.mubr.msk.f32.mxu0 %vm5117_vm0, %v5116_v0 }
 0x161   : > { %4717 = vmatprep.subr.mxu0 %v5116_v0 }
 0x163   : > { %4710 = vmatmul.mubr.msk.f32.vlgmr.msra.gmra.mrb[4].mxu1 %vm598_vm3, %v5545_v29  ;;  %4715 = vmatmul.mubr.msk.f32.vlgmr.msra.gmra.mrb[6].mxu0 %vm371_vm1, %v5385_v5 }
 0x164   : > { %4743 = vmatpush3.msra.mxu1 %v5496_v19  ;;  %4744 = vmatprep.mubr.msk.f32.mxu1 %vm5117_vm0, %v5116_v0 }
 0x165   : > { %4718 = vmatpush3.msra.mxu0 %v5478_v16  ;;  %4719 = vmatprep.mubr.msk.f32.mxu0 %vm5117_vm0, %v5116_v0 }
 0x166   : > { %4747 = vmatprep.subr.mxu1 %v5116_v0  ;;  %4722 = vmatprep.subr.mxu0 %v5116_v0 }
 0x167   : > { %4745 = vmatmul.mubr.msk.f32.vlgmr.msra.gmra.mrb[6].mxu1 %vm371_vm1, %v5385_v5 }
 0x168   : > { %4748 = vmatpush3.msra.mxu1 %v5485_v17  ;;  %4749 = vmatprep.mubr.msk.f32.mxu1 %vm5117_vm0, %v5116_v0 }
 0x169   : > { %4752 = vmatprep.subr.mxu1 %v5116_v0 }
 0x16b   : > { %4720 = vmatmul.mubr.msk.f32.vlgmr.msra.gmra.mrb[6].mxu0 %vm371_vm1, %v5410_v7 }
 0x16c   : > { %4723 = vmatpush3.msra.mxu0 %v5485_v17  ;;  %4724 = vmatprep.mubr.msk.f32.mxu0 %vm5117_vm0, %v5116_v0 }
 0x16d   : > { %4727 = vmatprep.subr.mxu0 %v5116_v0 }
 0x16f   : > { %4750 = vmatmul.mubr.msk.f32.vlgmr.msra.gmra.mrb[6].mxu1 %vm371_vm1, %v5410_v7 }
 0x170   : > { %4753 = vmatpush3.msra.mxu1 %v5502_v20  ;;  %4754 = vmatprep.mubr.msk.f32.mxu1 %vm5117_vm0, %v5116_v0 }
 0x171   : > { %4757 = vmatprep.subr.mxu1 %v5116_v0 }
 0x173   : > { %4725 = vmatmul.mubr.msk.f32.vlgmr.msra.gmra.mrb[6].mxu0 %vm371_vm1, %v5443_v11 }
 0x174   : > { %4728 = vmatpush3.msk.msra.mxu0 %vm602_vm2, %v3420_v42  ;;  %4729 = vmatprep.mubr.msk.f32.mxu0 %vm5117_vm0, %v5116_v0 }
 0x175   : > { %4732 = vmatprep.subr.mxu0 %v5116_v0 }
 0x177   : > { %4755 = vmatmul.mubr.msk.f32.vlgmr.msra.gmra.mrb[6].mxu1 %vm371_vm1, %v5443_v11 }
 0x178   : > { %4758 = vmatpush3.msk.msra.mxu1 %vm602_vm2, %v3889_v43  ;;  %4759 = vmatprep.mubr.msk.f32.mxu1 %vm5117_vm0, %v5116_v0 }
 0x179   : > { %4762 = vmatprep.subr.mxu1 %v5116_v0 }
 0x17b   : > { %4730 = vmatmul.mubr.msk.f32.vlgmr.msra.gmra.mrb[6].mxu0 %vm598_vm3, %v5511_v21 }
 0x17c   : > { %4733 = vmatpush3.msk.msra.mxu0 %vm602_vm2, %v3500_v44  ;;  %4734 = vmatprep.mubr.msk.f32.mxu0 %vm5117_vm0, %v5116_v0 }
 0x17d   : > { %4737 = vmatprep.subr.mxu0 %v5116_v0 }
 0x17f   : > { %4760 = vmatmul.mubr.msk.f32.vlgmr.msra.gmra.mrb[6].mxu1 %vm598_vm3, %v5511_v21 }
 0x180   : > { %4763 = vmatpush3.msk.msra.mxu1 %vm602_vm2, %v3969_v45  ;;  %4764 = vmatprep.mubr.msk.f32.mxu1 %vm5117_vm0, %v5116_v0 }
 0x181   : > { %4767 = vmatprep.subr.mxu1 %v5116_v0 }
 0x183   : > { %4735 = vmatmul.mubr.msk.f32.vlgmr.msra.gmra.mrb[6].mxu0 %vm598_vm3, %v5528_v26 }
 0x184   : > { %4738 = vmatpush3.msk.msra.mxu0 %vm602_vm2, %v3580_v46  ;;  %4739 = vmatprep.mubr.msk.f32.mxu0 %vm5117_vm0, %v5116_v0 }
 0x187   : > { %4765 = vmatmul.mubr.msk.f32.vlgmr.msra.gmra.mrb[6].mxu1 %vm598_vm3, %v5528_v26 }
 0x188   : > { %4768 = vmatpush3.msk.msra.mxu1 %vm602_vm2, %v4049_v47  ;;  %4769 = vmatprep.mubr.msk.f32.mxu1 %vm5117_vm0, %v5116_v0 }
 0x18b   : > { %4740 = vmatmul.mubr.msk.f32.vlgmr.msra.gmra.mrb[6].mxu0 %vm598_vm3, %v5545_v29 }
 0x18f   : > { %4770 = vmatmul.mubr.msk.f32.vlgmr.msra.gmra.mrb[6].mxu1 %vm598_vm3, %v5545_v29 }
 0x1da   : > { %v833_v48 = vpop.f32.mrb[0].mxu0 }
 0x1db   : > { %838 = vst.msk [vmem:[%s354_s14] sm:$0xff] %vm371_vm1, %v833_v48  ;;  %v4561_v49 = vpop.f32.mrb[1].mxu0 }
 0x1de   : > { %v1302_v50 = vpop.f32.mrb[0].mxu1 }
 0x1df   : > { %4327 = vst.msk [vmem:[%s354_s14 + $0x8] sm:$0xff] %vm371_vm1, %v1302_v50  ;;  %v4591_v51 = vpop.f32.mrb[1].mxu1 }
 0x206   : > { %v1772_v52 = vpop.f32.mrb[2].mxu0 }
 0x207   : > { %4344 = vst.msk [vmem:[%s354_s14 + $0x10] sm:$0xff] %vm371_vm1, %v1772_v52  ;;  %v4621_v53 = vpop.f32.mrb[3].mxu0 }
 0x20a   : > { %v2242_v54 = vpop.f32.mrb[2].mxu1 }
 0x20b   : > { %4361 = vst.msk [vmem:[%s354_s14 + $0x18] sm:$0xff] %vm371_vm1, %v2242_v54  ;;  %v4651_v55 = vpop.f32.mrb[3].mxu1 }
 0x232   : > { %v2712_v56 = vpop.f32.mrb[4].mxu0 }
 0x233   : > { %4378 = vst.msk [vmem:[%s354_s14 + $0x20] sm:$0xff] %vm371_vm1, %v2712_v56  ;;  %v4681_v57 = vpop.f32.mrb[5].mxu0 }
 0x236   : > { %v3182_v58 = vpop.f32.mrb[4].mxu1 }
 0x237   : > { %4395 = vst.msk [vmem:[%s354_s14 + $0x28] sm:$0xff] %vm371_vm1, %v3182_v58  ;;  %v4711_v59 = vpop.f32.mrb[5].mxu1 }
 0x25e   : > { %v3652_v60 = vpop.f32.mrb[6].mxu0 }
 0x25f   : > { %4412 = vst.msk [vmem:[%s354_s14 + $0x30] sm:$0xff] %vm371_vm1, %v3652_v60  ;;  %v4741_v61 = vpop.f32.mrb[7].mxu0 }
 0x262   : > { %v4121_v62 = vpop.f32.mrb[6].mxu1 }
 0x263   : > { %4428 = vst.msk [vmem:[%s354_s14 + $0x38] sm:$0xff] %vm371_vm1, %v4121_v62  ;;  %v4771_v63 = vpop.f32.mrb[7].mxu1 }
 0x264   : > { %5036 = shalt.err (!%p5033_p13)
}
 0x265   : > { %s5037_s20 = scalar_lea.hbm %s5783_s24, 1024  ;;  %s5041_s15 = scalar_lea.hbm %s5838_s5, 2048 }
 0x266   : > { %p5038_p11 = scmp.ne.s32.totalorder %s5783_s24, %s5037_s20  ;;  %p5042_p5 = scmp.lt.u32.totalorder %s5783_s24, %s5838_s5 }
 0x267   : > { %p5043_p1 = scmp.lt.u32.totalorder %s5041_s15, %s5037_s20  ;;  %p5045_p2 = scmp.lt.u32.totalorder %s5037_s20, %s5783_s24 }
 0x268   : > { %p5039_p7 = pnand %p5038_p11, %p5869_p6 }
 0x269   : > { %p5044_p0 = por %p5043_p1, %p5042_p5 }
 0x26a   : > { %p5040_p3 = pneg %p5039_p7 }
 0x26b   : > { %p5046_p8 = por %p5045_p2, %p5044_p0 }
 0x26d   : > { %p5047_p9 = pnand %p5046_p8, %p5040_p3 }
 0x26f   : > { %5050 = shalt.err (!%p5047_p9)
}
 0x270   : > { %s5120_s3 = smov 128   ;;  %s5121_s25 = smov 8  }
 0x271   : > { %4859 = dma.vmem_to_hbm [thread:$0]  (%p5869_p6), %s5777_s29, 1024, %s5783_s24, %s4129_s30, %s5120_s3, %s5120_s3, %s5121_s25  }
 0x272 PF: > { %s5870_s26 = sld [smem:[#allocation13_spill]]  ;;  %s4159_s7 = sand.u32 1, %s5089_s18  }
 0x273   : > { %p5871_p12 = scmp.ne.s32.totalorder %s5857_s8, 0  ;;  %s4160_s14 = scalar_lea.sflag [#allocation4], %s4159_s7 }
 0x278   : > { %p5872_p4 = scmp.ge.s32.totalorder %s5870_s26, 2 }
 0x27a   : > { %p4872_p10 = pnand %p5872_p4, %p5871_p12 }
 0x27c   : > { %5084 = dma.done.wait (!%p4872_p10), %s4160_s14, 1024  }
 0x27d   : > { %5086 = vsyncadd (!%p4872_p10), %s4160_s14, 4294966272  ;;  %s24_s23 = sadd.s32 1, %s5870_s26   ;;  %s5873_s2 = sld [smem:[#allocation12_spill]] }
 0x27e   : > { %p21_p13 = scmp.ge.s32.totalorder %s24_s23, 4   ;;  %s5874_s20 = sld [smem:[#allocation15_spill]] }
 0x27f   : > { %s5875_s6 = sld [smem:[#allocation14_spill]]  ;;  %s5876_s18 = smov %s5093_s19 }
 0x280   : > { %s5878_s21 = smov %s5105_s22  ;;  %23 = sbr.rel (!%p21_p13) target bundleno = 11 (0xb), region = 134 }
 0x283   : > { %s5877_s19 = smov %s5873_s2 }
 0x285   : > { %s5879_s22 = smov %s5875_s6 }
 0x287   :  { %4165 = vsyncpa [#allocation3], 1 }
 0x288   :  { %4167 = vsyncpa [#allocation3 + $0x1], 1 }
 0x289   :  { %4168 = vsyncpa [#allocation6], 1 }
 0x28a   :  { %4170 = vsyncpa [#allocation6 + $0x1], 1 }
 0x28b   :  { %4171 = vsyncpa [#allocation4], 1 }
 0x28c   :  { %4173 = vsyncpa [#allocation4 + $0x1], 1 }

</bundles_post_ra>
